<compile_context>
chip_gen: v7x
topology: tpu7x:2x2x1
jax: 0.10.0
libtpu: 0.0.40
codegen_flags: <defaults>
</compile_context>

<pallas_src>
import math

import jax
import jax.numpy as jnp
from jax.experimental import pallas as pl
from jax.experimental.pallas import tpu as pltpu

N_CHANNELS = 768              # self.nchannels
HIDDEN = int(768 // 0.77)     # = 997, fc1 output features
HIDDEN_PAD = 1024             # 997 padded up to a multiple of 128
POOL = 7                      # AvgPool2d(7) -> 7*7 = 49 spatial positions
LANE = 128


def _round_up(x, m):
    return ((x + m - 1) // m) * m


def _choose_batch_tiling(n, tm_max=128):
    """Pick (tm, n_pad) so padding waste is small and, when the batch allows,
    the grid has >=2 steps (lets "parallel" shard across 2 TCs on v7x)."""
    n_tiles = max(1, -(-n // tm_max))
    if n >= 16 and n_tiles < 2:
        n_tiles = 2
    tm = _round_up(-(-n // n_tiles), 8)
    return tm, n_tiles * tm


def _head_kernel(x_ref, w1_ref, b1_ref, w2_ref, b2_ref, o_ref):
    # x_ref : (TM, 768)    bf16  avg-pooled activations
    # w1_ref: (768, 1024)  bf16  fc1 weight^T, zero-padded cols 997..1023
    # b1_ref: (1, 1024)    f32
    # w2_ref: (1024, Cp)   f32   fc2 weight^T, zero-padded rows/cols
    # b2_ref: (1, Cp)      f32
    # o_ref : (TM, Cp)     f32
    # fc1 (MXU, bf16 inputs, f32 accumulation)
    h = jnp.dot(x_ref[...], w1_ref[...],
                preferred_element_type=jnp.float32) + b1_ref[...]   # (TM, 1024)

    # F.dropout with training=False / droprate_fc == 0 -> identity.
    # TODO(synk): training-mode dropout (mask + 1/(1-p) scale) not implemented.

    # fc2 — h kept in f32 (no re-quantization); fc2 is tiny so cost is negligible.
    y = jnp.dot(h, w2_ref[...],
                preferred_element_type=jnp.float32) + b2_ref[...]   # (TM, Cp)
    o_ref[...] = y.astype(o_ref.dtype)


def micronet_m1_head(x_nchw, w1, b1, w2, b2, *, tm_max=128):
    """x_nchw: (N, 768, 7, 7); w1: (997, 768); b1: (997,); w2: (C, 997); b2: (C,)."""
    n = x_nchw.shape[0]
    class_num = w2.shape[0]
    c_pad = _round_up(class_num, LANE)

    # AvgPool2d(7) + view(-1, 768): done by XLA fused with the single read of
    # x (one HBM pass); result is tiny (N, 768), cast to bf16 for the MXU.
    pooled = jnp.mean(
        jnp.asarray(x_nchw, jnp.float32).reshape(n, N_CHANNELS, POOL * POOL),
        axis=-1).astype(jnp.bfloat16)

    tm, n_pad = _choose_batch_tiling(n, tm_max)
    pooled = jnp.pad(pooled, ((0, n_pad - n), (0, 0)))

    # fc1 weight^T (768, 997) -> (768, 1024) bf16, zero-padded columns.
    w1t = jnp.asarray(w1, jnp.float32).T
    w1t = jnp.pad(w1t, ((0, 0), (0, HIDDEN_PAD - HIDDEN))).astype(jnp.bfloat16)
    b1r = jnp.pad(jnp.asarray(b1, jnp.float32),
                  (0, HIDDEN_PAD - HIDDEN)).reshape(1, HIDDEN_PAD)

    # fc2 weight^T (997, C) -> (1024, Cp) f32, zero-padded rows/cols.
    w2t = jnp.asarray(w2, jnp.float32).T
    w2t = jnp.pad(w2t, ((0, HIDDEN_PAD - HIDDEN), (0, c_pad - class_num)))
    b2r = jnp.pad(jnp.asarray(b2, jnp.float32),
                  (0, c_pad - class_num)).reshape(1, c_pad)

    grid = (n_pad // tm,)
    cost = pl.CostEstimate(
        flops=2 * n_pad * (N_CHANNELS * HIDDEN_PAD + HIDDEN_PAD * c_pad),
        transcendentals=0,
        bytes_accessed=(pooled.size * 2 + w1t.size * 2 + w2t.size * 4
                        + b1r.size * 4 + b2r.size * 4 + n_pad * c_pad * 4),
    )

    out = pl.pallas_call(
        _head_kernel,
        out_shape=jax.ShapeDtypeStruct((n_pad, c_pad), jnp.float32),
        grid=grid,
        in_specs=[
            pl.BlockSpec((tm, N_CHANNELS), lambda i: (i, 0)),
            pl.BlockSpec((N_CHANNELS, HIDDEN_PAD), lambda i: (0, 0)),  # resident
            pl.BlockSpec((1, HIDDEN_PAD), lambda i: (0, 0)),           # resident
            pl.BlockSpec((HIDDEN_PAD, c_pad), lambda i: (0, 0)),       # resident
            pl.BlockSpec((1, c_pad), lambda i: (0, 0)),                # resident
        ],
        out_specs=pl.BlockSpec((tm, c_pad), lambda i: (i, 0)),
        compiler_params=pltpu.CompilerParams(
            dimension_semantics=("parallel",),
            vmem_limit_bytes=48 << 20,   # generous headroom, < v7x 64 MiB physical
        ),
        cost_estimate=cost,
    )(pooled, w1t, b1r, w2t, b2r)

    return out[:n, :class_num]


def init_head_params(key, class_num):
    """Deterministic synthetic parameters matching the module's shapes.
    Per MicroNet_M1.__init__: Linear biases are zeroed; weights random."""
    k1, k2 = jax.random.split(key)
    w1 = jax.random.normal(k1, (HIDDEN, N_CHANNELS), jnp.float32) * (
        1.0 / math.sqrt(N_CHANNELS))
    b1 = jnp.zeros((HIDDEN,), jnp.float32)
    w2 = jax.random.normal(k2, (class_num, HIDDEN), jnp.float32) * (
        1.0 / math.sqrt(HIDDEN))
    b2 = jnp.zeros((class_num,), jnp.float32)
    return w1, b1, w2, b2


def _reference_head_f32(x_nchw, w1, b1, w2, b2):
    """Pure-f32 reference of the PyTorch head (semantics check)."""
    n = x_nchw.shape[0]
    pooled = jnp.mean(x_nchw.reshape(n, N_CHANNELS, -1), axis=-1)
    h = pooled @ w1.T + b1
    return h @ w2.T + b2


def _reference_head_quantized(x_nchw, w1, b1, w2, b2):
    """Reference that mirrors the kernel's bf16 fc1 quantization (tight check)."""
    n = x_nchw.shape[0]
    pooled = jnp.mean(x_nchw.reshape(n, N_CHANNELS, -1), axis=-1).astype(jnp.bfloat16)
    w1t = jnp.asarray(w1, jnp.float32).T.astype(jnp.bfloat16)
    h = jnp.dot(pooled, w1t, preferred_element_type=jnp.float32) + b1
    return jnp.dot(h, jnp.asarray(w2, jnp.float32).T,
                   preferred_element_type=jnp.float32) + b2


if __name__ == "__main__":
    class_num = 16
    key = jax.random.PRNGKey(0)
    kx, kp = jax.random.split(key)

    # Head-input feature map implied by the forward pass:
    # (batch, nchannels=768, 7, 7) just before AvgPool2d(7).
    x = jax.random.normal(kx, (2, N_CHANNELS, POOL, POOL), jnp.float32)
    w1, b1, w2, b2 = init_head_params(kp, class_num)

    out = micronet_m1_head(x, w1, b1, w2, b2)
    out = jax.block_until_ready(out)
    assert out.shape == (2, class_num)

    # Tight check vs. a reference that applies the same bf16 fc1 quantization.
    ref_q = _reference_head_quantized(x, w1, b1, w2, b2)
    assert jnp.allclose(out, ref_q, atol=1e-2, rtol=1e-2)

    # Looser semantics check vs. the pure-f32 PyTorch-equivalent head
    # (difference is only the bf16 fc1 weight/activation quantization).
    ref_f32 = _reference_head_f32(x, w1, b1, w2, b2)
    assert jnp.allclose(out, ref_f32, atol=5e-2, rtol=5e-2)

    print("KERNEL_OK")
</pallas_src>

<mosaic_0001>
module attributes {stable_mosaic.version = 11 : i64} {
  func.func @_head_kernel(%arg0: i32, %arg1: memref<8x768xbf16, #tpu.memory_space<vmem>>, %arg2: memref<768x1024xbf16, #tpu.memory_space<vmem>>, %arg3: memref<1x1024xf32, #tpu.memory_space<vmem>>, %arg4: memref<1024x128xf32, #tpu.memory_space<vmem>>, %arg5: memref<1x128xf32, #tpu.memory_space<vmem>>, %arg6: memref<8x128xf32, #tpu.memory_space<vmem>>) attributes {dimension_semantics = [#tpu.dimension_semantics<parallel>], iteration_bounds = array<i64: 1>, scalar_prefetch = 0 : i64, scratch_operands = 0 : i64, tpu.core_type = #tpu.core_type<tc>, window_params = [{transform_indices = @transform_0, window_bounds = array<i64: 8, 768>}, {pipeline_mode = #tpu.pipeline_mode<synchronous>, transform_indices = @transform_1, window_bounds = array<i64: 768, 1024>}, {pipeline_mode = #tpu.pipeline_mode<synchronous>, transform_indices = @transform_2, window_bounds = array<i64: 1, 1024>}, {pipeline_mode = #tpu.pipeline_mode<synchronous>, transform_indices = @transform_3, window_bounds = array<i64: 1024, 128>}, {pipeline_mode = #tpu.pipeline_mode<synchronous>, transform_indices = @transform_4, window_bounds = array<i64: 1, 128>}, {transform_indices = @transform_5, window_bounds = array<i64: 8, 128>}]} {
    %c0 = arith.constant 0 : index
    %c0_0 = arith.constant 0 : index
    %0 = vector.load %arg1[%c0, %c0_0] : memref<8x768xbf16, #tpu.memory_space<vmem>>, vector<8x768xbf16>
    %c0_1 = arith.constant 0 : index
    %c0_2 = arith.constant 0 : index
    %1 = vector.load %arg2[%c0_1, %c0_2] : memref<768x1024xbf16, #tpu.memory_space<vmem>>, vector<768x1024xbf16>
    %cst = arith.constant dense<0.000000e+00> : vector<8x1024xf32>
    %2 = tpu.matmul %0, %1, %cst {dimension_numbers = #tpu.dot_dimension_numbers<[1], [0], [0], [1], [0, 0, 1, 1], [], []>} : vector<8x768xbf16>, vector<768x1024xbf16>, vector<8x1024xf32> -> vector<8x1024xf32>
    %c0_3 = arith.constant 0 : index
    %c0_4 = arith.constant 0 : index
    %3 = vector.load %arg3[%c0_3, %c0_4] : memref<1x1024xf32, #tpu.memory_space<vmem>>, vector<1x1024xf32>
    %4 = vector.broadcast %3 : vector<1x1024xf32> to vector<8x1024xf32>
    %5 = arith.addf %2, %4 : vector<8x1024xf32>
    %c0_5 = arith.constant 0 : index
    %c0_6 = arith.constant 0 : index
    %6 = vector.load %arg4[%c0_5, %c0_6] : memref<1024x128xf32, #tpu.memory_space<vmem>>, vector<1024x128xf32>
    %cst_7 = arith.constant dense<0.000000e+00> : vector<8x128xf32>
    %7 = tpu.matmul %5, %6, %cst_7 {dimension_numbers = #tpu.dot_dimension_numbers<[1], [0], [0], [1], [0, 0, 1, 1], [], []>} : vector<8x1024xf32>, vector<1024x128xf32>, vector<8x128xf32> -> vector<8x128xf32>
    %c0_8 = arith.constant 0 : index
    %c0_9 = arith.constant 0 : index
    %8 = vector.load %arg5[%c0_8, %c0_9] : memref<1x128xf32, #tpu.memory_space<vmem>>, vector<1x128xf32>
    %9 = vector.broadcast %8 : vector<1x128xf32> to vector<8x128xf32>
    %10 = arith.addf %7, %9 : vector<8x128xf32>
    %c0_10 = arith.constant 0 : index
    %c0_11 = arith.constant 0 : index
    %11 = vector.load %arg6[%c0_10, %c0_11] : memref<8x128xf32, #tpu.memory_space<vmem>>, vector<8x128xf32>
    tpu.vector_store %arg6[%c0_10, %c0_11], %10 {strides = array<i32>} : memref<8x128xf32, #tpu.memory_space<vmem>>, vector<8x128xf32>,
    return
  }
  func.func @transform_0(%arg0: i32) -> (i32, i32) {
    %c0_i32 = arith.constant 0 : i32
    %c0_i32_0 = arith.constant 0 : i32
    return %arg0, %c0_i32 : i32, i32
  }
  func.func @transform_1(%arg0: i32) -> (i32, i32) {
    %c0_i32 = arith.constant 0 : i32
    %c0_i32_0 = arith.constant 0 : i32
    %c0_i32_1 = arith.constant 0 : i32
    return %c0_i32, %c0_i32_0 : i32, i32
  }
  func.func @transform_2(%arg0: i32) -> (i32, i32) {
    %c0_i32 = arith.constant 0 : i32
    %c0_i32_0 = arith.constant 0 : i32
    %c0_i32_1 = arith.constant 0 : i32
    return %c0_i32, %c0_i32_0 : i32, i32
  }
  func.func @transform_3(%arg0: i32) -> (i32, i32) {
    %c0_i32 = arith.constant 0 : i32
    %c0_i32_0 = arith.constant 0 : i32
    %c0_i32_1 = arith.constant 0 : i32
    return %c0_i32, %c0_i32_0 : i32, i32
  }
  func.func @transform_4(%arg0: i32) -> (i32, i32) {
    %c0_i32 = arith.constant 0 : i32
    %c0_i32_0 = arith.constant 0 : i32
    %c0_i32_1 = arith.constant 0 : i32
    return %c0_i32, %c0_i32_0 : i32, i32
  }
  func.func @transform_5(%arg0: i32) -> (i32, i32) {
    %c0_i32 = arith.constant 0 : i32
    %c0_i32_0 = arith.constant 0 : i32
    return %arg0, %c0_i32 : i32, i32
  }
}

</mosaic_0001>

<bundles_post_ra>
// kernel: tpu_custom_call.1
= control target key start
LH: loop header
LB: loop body
LE: loop exit
PB: predicated region body
PF: predicated region fallthrough
CT: control target
= control target key end

     0   :  { %10 = vsyncpa [#allocation3], 0  ;;  %s4419_s0 = inlined_call_operand.hbm [shape: bf16[8,768], index: 0, kind: input, shape index: {}]   ;;  %s4420_s1 = inlined_call_operand.hbm [shape: bf16[768,1024], index: 1, kind: input, shape index: {}]   ;;  %s4421_s2 = inlined_call_operand.hbm [shape: f32[1,1024], index: 2, kind: input, shape index: {}]   ;;  %s4422_s3 = inlined_call_operand.hbm [shape: f32[1024,128], index: 3, kind: input, shape index: {}]   ;;  %s4423_s4 = inlined_call_operand.hbm [shape: f32[1,128], index: 4, kind: input, shape index: {}]   ;;  %s4424_s5 = inlined_call_operand.hbm [shape: f32[8,128], index: 5, kind: output, shape index: {}]  }
   0x1   :  { %11 = vsyncpa [#allocation6], 0 }
   0x2   :  { %12 = vsyncpa [#allocation9], 0 }
   0x3   :  { %13 = vsyncpa [#allocation4], 0  ;;  %s4233_s18 = smov [#allocation5]   ;;  %s4093_s22 = scalar_lea.hbm %s4420_s1, 49152 }
   0x4   :  { %s29_s19 = sshll.u32 %s4233_s18, 4  ;;  %p4094_p0 = scmp.ne.s32.totalorder %s4420_s1, %s4093_s22  ;;  %s30_s19 = int_to_ptr.vmem [resolvable:$true] %s29_s19 }
   0x5   :  { %p4097_p1 = scmp.lt.u32.totalorder %s4093_s22, %s4420_s1 }
   0x7   :  { %p4099_p2 = pnand %p4097_p1, %p4094_p0 }
   0x9   :  { %4102 = shalt.err (!%p4099_p2)
}
   0xa   :  { %s4103_s27 = scalar_lea.vmem %s30_s19, 49152  ;;  %p4108_p4 = scmp.lt.s32.totalorder %s30_s19, %s30_s19 }
   0xb   :  { %p4104_p3 = scmp.ne.s32.totalorder %s30_s19, %s4103_s27  ;;  %p4109_p5 = scmp.lt.s32.totalorder %s4103_s27, %s4103_s27 }
   0xd   :  { %p4110_p6 = por %p4109_p5, %p4108_p4 }
   0xf   :  { %p4111_p7 = pnand %p4110_p6, %p4104_p3 }
  0x11   :  { %4114 = shalt.err (!%p4111_p7)
}
  0x12   :  { %s4234_s28 = smov 512   ;;  %s4235_s29 = smov 32  }
  0x13   :  { %35 = dma.hbm_to_vmem [thread:$0]  %s4420_s1, 49152, %s30_s19, [#allocation6], %s4234_s28, %s4234_s28, %s4235_s29  }
  0x14   :  { %s4236_s7 = smov [#allocation8]   ;;  %s4115_s11 = scalar_lea.hbm %s4422_s3, 16384 }
  0x15   :  { %s51_s8 = sshll.u32 %s4236_s7, 4  ;;  %p4116_p8 = scmp.ne.s32.totalorder %s4422_s3, %s4115_s11  ;;  %s52_s8 = int_to_ptr.vmem [resolvable:$true] %s51_s8 }
  0x16   :  { %p4119_p9 = scmp.lt.u32.totalorder %s4115_s11, %s4422_s3 }
  0x18   :  { %p4121_p10 = pnand %p4119_p9, %p4116_p8 }
  0x1a   :  { %4124 = shalt.err (!%p4121_p10)
}
  0x1b   :  { %s4125_s16 = scalar_lea.vmem %s52_s8, 16384  ;;  %p4130_p12 = scmp.lt.s32.totalorder %s52_s8, %s52_s8 }
  0x1c   :  { %p4126_p11 = scmp.ne.s32.totalorder %s52_s8, %s4125_s16  ;;  %p4131_p13 = scmp.lt.s32.totalorder %s4125_s16, %s4125_s16 }
  0x1e   :  { %p4132_p0 = por %p4131_p13, %p4130_p12 }
  0x20   :  { %p4133_p1 = pnand %p4132_p0, %p4126_p11 }
  0x22   :  { %4136 = shalt.err (!%p4133_p1)
}
  0x23   :  { %s4237_s1 = smov 128   ;;  %s4238_s17 = smov 8  }
  0x24   :  { %57 = dma.hbm_to_vmem [thread:$0]  %s4422_s3, 16384, %s52_s8, [#allocation9], %s4237_s1, %s4237_s1, %s4238_s17  }
  0x25   :  { %s4239_s20 = smov [#allocation2]   ;;  %s4240_s22 = smov [#allocation7]  }
  0x26   :  { %s20_s21 = sshll.u32 %s4239_s20, 4  ;;  %s42_s23 = sshll.u32 %s4240_s22, 4  ;;  %s21_s21 = int_to_ptr.vmem [resolvable:$true] %s20_s21  ;;  %s43_s23 = int_to_ptr.vmem [resolvable:$true] %s42_s23 }
  0x27   :  { %s4137_s26 = scalar_lea.hbm %s4419_s0, 384 }
  0x28   :  { %p4138_p2 = scmp.ne.s32.totalorder %s4419_s0, %s4137_s26  ;;  %p4141_p3 = scmp.lt.u32.totalorder %s4137_s26, %s4419_s0 }
  0x2a   :  { %p4143_p4 = pnand %p4141_p3, %p4138_p2 }
  0x2c   :  { %4146 = shalt.err (!%p4143_p4)
}
  0x2d   :  { %s4147_s3 = scalar_lea.vmem %s21_s21, 384  ;;  %p4152_p6 = scmp.lt.s32.totalorder %s21_s21, %s21_s21 }
  0x2e   :  { %p4148_p5 = scmp.ne.s32.totalorder %s21_s21, %s4147_s3  ;;  %p4153_p7 = scmp.lt.s32.totalorder %s4147_s3, %s4147_s3 }
  0x30   :  { %p4154_p8 = por %p4153_p7, %p4152_p6 }
  0x32   :  { %p4155_p9 = pnand %p4154_p8, %p4148_p5 }
  0x34   :  { %4158 = shalt.err (!%p4155_p9)
}
  0x35   :  { %23 = dma.hbm_to_vmem [thread:$0]  %s4419_s0, 384, %s21_s21, [#allocation3]  }
  0x36   :  { %s4159_s10 = scalar_lea.hbm %s4421_s2, 128 }
  0x37   :  { %p4160_p10 = scmp.ne.s32.totalorder %s4421_s2, %s4159_s10  ;;  %p4163_p11 = scmp.lt.u32.totalorder %s4159_s10, %s4421_s2 }
  0x39   :  { %p4165_p12 = pnand %p4163_p11, %p4160_p10 }
  0x3b   :  { %4168 = shalt.err (!%p4165_p12)
}
  0x3c   :  { %s4169_s15 = scalar_lea.vmem %s43_s23, 128  ;;  %p4174_p0 = scmp.lt.s32.totalorder %s43_s23, %s43_s23 }
  0x3d   :  { %p4170_p13 = scmp.ne.s32.totalorder %s43_s23, %s4169_s15  ;;  %p4175_p1 = scmp.lt.s32.totalorder %s4169_s15, %s4169_s15 }
  0x3f   :  { %p4176_p2 = por %p4175_p1, %p4174_p0 }
  0x41   :  { %p4177_p3 = pnand %p4176_p2, %p4170_p13 }
  0x43   :  { %4180 = shalt.err (!%p4177_p3)
}
  0x44   :  { %45 = dma.hbm_to_vmem [thread:$0]  %s4421_s2, 128, %s43_s23, [#allocation6]  }
  0x45   :  { %s4241_s1 = smov [#allocation10]   ;;  %s4181_s20 = scalar_lea.hbm %s4423_s4, 16 }
  0x46   :  { %s64_s17 = sshll.u32 %s4241_s1, 4  ;;  %p4182_p4 = scmp.ne.s32.totalorder %s4423_s4, %s4181_s20  ;;  %s65_s17 = int_to_ptr.vmem [resolvable:$true] %s64_s17 }
  0x47   :  { %p4185_p5 = scmp.lt.u32.totalorder %s4181_s20, %s4423_s4 }
  0x49   :  { %p4187_p6 = pnand %p4185_p5, %p4182_p4 }
  0x4b   :  { %4190 = shalt.err (!%p4187_p6)
}
  0x4c   :  { %s4191_s26 = scalar_lea.vmem %s65_s17, 16  ;;  %s4195_s2 = scalar_lea.vmem %s65_s17, 32 }
  0x4d   :  { %p4192_p7 = scmp.ne.s32.totalorder %s65_s17, %s4191_s26  ;;  %p4196_p8 = scmp.lt.s32.totalorder %s65_s17, %s65_s17 }
  0x4e   :  { %p4197_p9 = scmp.lt.s32.totalorder %s4195_s2, %s4191_s26 }
  0x50   :  { %p4198_p10 = por %p4197_p9, %p4196_p8 }
  0x52   :  { %p4199_p11 = pnand %p4198_p10, %p4192_p7 }
  0x54   :  { %4202 = shalt.err (!%p4199_p11)
}
  0x55   :  { %67 = dma.hbm_to_vmem [thread:$0]  %s4423_s4, 16, %s65_s17, [#allocation9]  }
  0x56   :  { %4225 = dma.done.wait [#allocation3], 384  }
  0x57   :  { %4226 = vsyncadd [#allocation3], 4294966912 }
  0x58   :  { %4227 = dma.done.wait [#allocation6], 49280  }
  0x59   :  { %4228 = vsyncadd [#allocation6], 4294918016 }
  0x5a   :  { %4229 = dma.done.wait [#allocation9], 16400  }
  0x5b   :  { %4230 = vsyncadd [#allocation9], 4294950896  ;;  %v86_v0 = vld [vmem:[#allocation5] sm:$0xff]  ;;  %v87_v2 = vld [vmem:[#allocation5 + $0x8] sm:$0xff]  ;;  %s4242_s4 = smov [#allocation11]  }
  0x5c   :  { %v90_v1 = vld [vmem:[#allocation5 + $0x20] sm:$0xff]  ;;  %v91_v4 = vld [vmem:[#allocation5 + $0x28] sm:$0xff]  ;;  %s3367_s28 = sshll.u32 %s4242_s4, 4  ;;  %s3368_s28 = int_to_ptr.vmem [resolvable:$true] %s3367_s28 }
  0x5d   :  { %v3385_v3 = vcombine.high %v86_v0, %v90_v1  ;;  %v3384_v5 = vcombine.low %v86_v0, %v90_v1  ;;  %v94_v6 = vld [vmem:[#allocation5 + $0x40] sm:$0xff]  ;;  %v3387_v8 = vcombine.high %v87_v2, %v91_v4  ;;  %v3386_v9 = vcombine.low %v87_v2, %v91_v4  ;;  %v95_v11 = vld [vmem:[#allocation5 + $0x48] sm:$0xff]  ;;  %s4203_s29 = scalar_lea.vmem %s3368_s28, 128  ;;  %p4208_p13 = scmp.lt.s32.totalorder %s3368_s28, %s3368_s28 }
  0x5e   :  { %v98_v7 = vld [vmem:[#allocation5 + $0x60] sm:$0xff]  ;;  %v99_v12 = vld [vmem:[#allocation5 + $0x68] sm:$0xff]  ;;  %p4204_p12 = scmp.ne.s32.totalorder %s3368_s28, %s4203_s29  ;;  %p4209_p0 = scmp.lt.s32.totalorder %s4203_s29, %s4203_s29 }
  0x5f   :  { %v3393_v10 = vcombine.high %v94_v6, %v98_v7  ;;  %v102_v13 = vld [vmem:[#allocation5 + $0x80] sm:$0xff]  ;;  %2453 = vmatprep.subr.bf16.mxu0 %v3385_v3  ;;  %v3395_v14 = vcombine.high %v95_v11, %v99_v12  ;;  %v103_v16 = vld [vmem:[#allocation5 + $0x88] sm:$0xff]  ;;  %2576 = vmatprep.subr.bf16.mxu1 %v3387_v8  ;;  %v3392_v18 = vcombine.low %v94_v6, %v98_v7 }
  0x60   :  { %v106_v15 = vld [vmem:[#allocation5 + $0xa0] sm:$0xff]  ;;  %v107_v17 = vld [vmem:[#allocation5 + $0xa8] sm:$0xff]  ;;  %2454 = vmatpush1.bf16.msra.mxu0 %v3384_v5  ;;  %2577 = vmatpush1.bf16.msra.mxu1 %v3386_v9  ;;  %v3394_v19 = vcombine.low %v95_v11, %v99_v12  ;;  %p4210_p1 = por %p4209_p0, %p4208_p13 }
  0x61   :  { %2455 = vmatprep.subr.bf16.mxu0 %v3393_v10  ;;  %v3401_v20 = vcombine.high %v102_v13, %v106_v15  ;;  %2578 = vmatprep.subr.bf16.mxu1 %v3395_v14  ;;  %v3403_v21 = vcombine.high %v103_v16, %v107_v17  ;;  %v110_v22 = vld [vmem:[#allocation5 + $0xc0] sm:$0xff]  ;;  %v111_v24 = vld [vmem:[#allocation5 + $0xc8] sm:$0xff]  ;;  %v3400_v26 = vcombine.low %v102_v13, %v106_v15 }
  0x62   :  { %v114_v23 = vld [vmem:[#allocation5 + $0xe0] sm:$0xff]  ;;  %v115_v25 = vld [vmem:[#allocation5 + $0xe8] sm:$0xff]  ;;  %v3402_v27 = vcombine.low %v103_v16, %v107_v17  ;;  %p4211_p2 = pnand %p4210_p1, %p4204_p12 }
  0x63   :  { %v3409_v28 = vcombine.high %v110_v22, %v114_v23  ;;  %v3411_v29 = vcombine.high %v111_v24, %v115_v25  ;;  %v118_v30 = vld [vmem:[#allocation5 + $0x100] sm:$0xff]  ;;  %v119_v32 = vld [vmem:[#allocation5 + $0x108] sm:$0xff]  ;;  %v3408_v34 = vcombine.low %v110_v22, %v114_v23  ;;  %v3410_v35 = vcombine.low %v111_v24, %v115_v25 }
  0x64   :  { %2456 = vmatpush1.bf16.msra.mxu0 %v3392_v18  ;;  %2579 = vmatpush1.bf16.msra.mxu1 %v3394_v19  ;;  %v122_v31 = vld [vmem:[#allocation5 + $0x120] sm:$0xff]  ;;  %v123_v33 = vld [vmem:[#allocation5 + $0x128] sm:$0xff] }
  0x65   :  { %2457 = vmatprep.subr.bf16.mxu0 %v3401_v20  ;;  %2580 = vmatprep.subr.bf16.mxu1 %v3403_v21  ;;  %v3417_v36 = vcombine.high %v118_v30, %v122_v31  ;;  %v3419_v37 = vcombine.high %v119_v32, %v123_v33  ;;  %v126_v38 = vld [vmem:[#allocation5 + $0x140] sm:$0xff]  ;;  %v127_v40 = vld [vmem:[#allocation5 + $0x148] sm:$0xff]  ;;  %v3416_v42 = vcombine.low %v118_v30, %v122_v31 }
  0x66   :  { %v130_v39 = vld [vmem:[#allocation5 + $0x160] sm:$0xff]  ;;  %v131_v41 = vld [vmem:[#allocation5 + $0x168] sm:$0xff]  ;;  %v3418_v43 = vcombine.low %v119_v32, %v123_v33 }
  0x67   :  { %v3425_v44 = vcombine.high %v126_v38, %v130_v39  ;;  %v3427_v45 = vcombine.high %v127_v40, %v131_v41  ;;  %v134_v46 = vld [vmem:[#allocation5 + $0x180] sm:$0xff]  ;;  %v135_v48 = vld [vmem:[#allocation5 + $0x188] sm:$0xff]  ;;  %v3424_v50 = vcombine.low %v126_v38, %v130_v39  ;;  %v3426_v51 = vcombine.low %v127_v40, %v131_v41 }
  0x68   :  { %2458 = vmatpush1.bf16.msra.mxu0 %v3400_v26  ;;  %2581 = vmatpush1.bf16.msra.mxu1 %v3402_v27  ;;  %v138_v47 = vld [vmem:[#allocation5 + $0x1a0] sm:$0xff]  ;;  %v139_v49 = vld [vmem:[#allocation5 + $0x1a8] sm:$0xff] }
  0x69   :  { %2459 = vmatprep.subr.bf16.mxu0 %v3409_v28  ;;  %2582 = vmatprep.subr.bf16.mxu1 %v3411_v29  ;;  %v3433_v52 = vcombine.high %v134_v46, %v138_v47  ;;  %v4333_v53 = vld [vmem:[#allocation2] sm:$0xff]  ;;  %v3435_v54 = vcombine.high %v135_v48, %v139_v49  ;;  %v142_v55 = vld [vmem:[#allocation5 + $0x1c0] sm:$0xff]  ;;  %v3432_v60 = vcombine.low %v134_v46, %v138_v47 }
  0x6a   :  { %v146_v56 = vld [vmem:[#allocation5 + $0x1e0] sm:$0xff]  ;;  %v4337_v57 = vcombine.high %v4333_v53, %v4333_v53  ;;  %v143_v58 = vld [vmem:[#allocation5 + $0x1c8] sm:$0xff]  ;;  %v3434_v61 = vcombine.low %v135_v48, %v139_v49 }
  0x6b   :  { %v147_v59 = vld [vmem:[#allocation5 + $0x1e8] sm:$0xff]  ;;  %v3441_v62 = vcombine.high %v142_v55, %v146_v56  ;;  %v150_v0 = vld [vmem:[#allocation5 + $0x200] sm:$0xff]  ;;  %v3440_v4 = vcombine.low %v142_v55, %v146_v56 }
  0x6c   :  { %2460 = vmatpush1.bf16.msra.mxu0 %v3408_v34  ;;  %2583 = vmatpush1.bf16.msra.mxu1 %v3410_v35  ;;  %v3443_v63 = vcombine.high %v143_v58, %v147_v59  ;;  %v154_v1 = vld [vmem:[#allocation5 + $0x220] sm:$0xff]  ;;  %v151_v2 = vld [vmem:[#allocation5 + $0x208] sm:$0xff]  ;;  %v3442_v5 = vcombine.low %v143_v58, %v147_v59 }
  0x6d   :  { %2461 = vmatprep.subr.bf16.mxu0 %v3417_v36  ;;  %2584 = vmatprep.subr.bf16.mxu1 %v3419_v37  ;;  %v155_v3 = vld [vmem:[#allocation5 + $0x228] sm:$0xff]  ;;  %v3449_v6 = vcombine.high %v150_v0, %v154_v1  ;;  %v158_v8 = vld [vmem:[#allocation5 + $0x240] sm:$0xff]  ;;  %v3448_v12 = vcombine.low %v150_v0, %v154_v1 }
  0x6e   :  { %2485 = vmatprep.mubr.bf16.mxu0 %v4337_v57  ;;  %2608 = vmatprep.mubr.bf16.mxu1 %v4337_v57  ;;  %v3451_v7 = vcombine.high %v151_v2, %v155_v3  ;;  %v162_v9 = vld [vmem:[#allocation5 + $0x260] sm:$0xff]  ;;  %v159_v10 = vld [vmem:[#allocation5 + $0x248] sm:$0xff]  ;;  %v3450_v13 = vcombine.low %v151_v2, %v155_v3 }
  0x6f   :  { %v163_v11 = vld [vmem:[#allocation5 + $0x268] sm:$0xff]  ;;  %v3457_v14 = vcombine.high %v158_v8, %v162_v9  ;;  %v166_v16 = vld [vmem:[#allocation5 + $0x280] sm:$0xff]  ;;  %v3456_v20 = vcombine.low %v158_v8, %v162_v9 }
  0x70   :  { %2462 = vmatpush1.bf16.msra.mxu0 %v3416_v42  ;;  %2585 = vmatpush1.bf16.msra.mxu1 %v3418_v43  ;;  %v3459_v15 = vcombine.high %v159_v10, %v163_v11  ;;  %v170_v17 = vld [vmem:[#allocation5 + $0x2a0] sm:$0xff]  ;;  %v167_v18 = vld [vmem:[#allocation5 + $0x288] sm:$0xff]  ;;  %v3458_v21 = vcombine.low %v159_v10, %v163_v11 }
  0x71   :  { %2463 = vmatprep.subr.bf16.mxu0 %v3425_v44  ;;  %2586 = vmatprep.subr.bf16.mxu1 %v3427_v45  ;;  %v171_v19 = vld [vmem:[#allocation5 + $0x2a8] sm:$0xff]  ;;  %v3465_v22 = vcombine.high %v166_v16, %v170_v17  ;;  %v174_v24 = vld [vmem:[#allocation5 + $0x2c0] sm:$0xff]  ;;  %v3464_v28 = vcombine.low %v166_v16, %v170_v17 }
  0x72   :  { %v3467_v23 = vcombine.high %v167_v18, %v171_v19  ;;  %v178_v25 = vld [vmem:[#allocation5 + $0x2e0] sm:$0xff]  ;;  %v175_v26 = vld [vmem:[#allocation5 + $0x2c8] sm:$0xff]  ;;  %v3466_v29 = vcombine.low %v167_v18, %v171_v19 }
  0x73   :  { %v179_v27 = vld [vmem:[#allocation5 + $0x2e8] sm:$0xff]  ;;  %v3473_v30 = vcombine.high %v174_v24, %v178_v25  ;;  %v182_v32 = vld [vmem:[#allocation5 + $0x300] sm:$0xff]  ;;  %v3472_v36 = vcombine.low %v174_v24, %v178_v25 }
  0x74   :  { %2464 = vmatpush1.bf16.msra.mxu0 %v3424_v50  ;;  %2587 = vmatpush1.bf16.msra.mxu1 %v3426_v51  ;;  %v3475_v31 = vcombine.high %v175_v26, %v179_v27  ;;  %v186_v33 = vld [vmem:[#allocation5 + $0x320] sm:$0xff]  ;;  %v183_v34 = vld [vmem:[#allocation5 + $0x308] sm:$0xff]  ;;  %v3474_v37 = vcombine.low %v175_v26, %v179_v27 }
  0x75   :  { %2465 = vmatprep.subr.bf16.mxu0 %v3433_v52  ;;  %2588 = vmatprep.subr.bf16.mxu1 %v3435_v54  ;;  %v187_v35 = vld [vmem:[#allocation5 + $0x328] sm:$0xff]  ;;  %v3481_v38 = vcombine.high %v182_v32, %v186_v33  ;;  %v190_v40 = vld [vmem:[#allocation5 + $0x340] sm:$0xff]  ;;  %v3480_v44 = vcombine.low %v182_v32, %v186_v33 }
  0x76   :  { %v3483_v39 = vcombine.high %v183_v34, %v187_v35  ;;  %v194_v41 = vld [vmem:[#allocation5 + $0x360] sm:$0xff]  ;;  %v191_v42 = vld [vmem:[#allocation5 + $0x348] sm:$0xff]  ;;  %v3482_v45 = vcombine.low %v183_v34, %v187_v35 }
  0x77   :  { %v195_v43 = vld [vmem:[#allocation5 + $0x368] sm:$0xff]  ;;  %v3489_v46 = vcombine.high %v190_v40, %v194_v41  ;;  %v198_v48 = vld [vmem:[#allocation5 + $0x380] sm:$0xff]  ;;  %v3488_v52 = vcombine.low %v190_v40, %v194_v41 }
  0x78   :  { %2466 = vmatpush1.bf16.msra.mxu0 %v3432_v60  ;;  %2589 = vmatpush1.bf16.msra.mxu1 %v3434_v61  ;;  %v3491_v47 = vcombine.high %v191_v42, %v195_v43  ;;  %v202_v49 = vld [vmem:[#allocation5 + $0x3a0] sm:$0xff]  ;;  %v199_v50 = vld [vmem:[#allocation5 + $0x388] sm:$0xff]  ;;  %v3490_v54 = vcombine.low %v191_v42, %v195_v43 }
  0x79   :  { %2467 = vmatprep.subr.bf16.mxu0 %v3441_v62  ;;  %2590 = vmatprep.subr.bf16.mxu1 %v3443_v63  ;;  %v203_v51 = vld [vmem:[#allocation5 + $0x3a8] sm:$0xff]  ;;  %v3497_v55 = vcombine.high %v198_v48, %v202_v49  ;;  %v206_v58 = vld [vmem:[#allocation5 + $0x3c0] sm:$0xff]  ;;  %v3496_v62 = vcombine.low %v198_v48, %v202_v49 }
  0x7a   :  { %v3499_v56 = vcombine.high %v199_v50, %v203_v51  ;;  %v210_v59 = vld [vmem:[#allocation5 + $0x3e0] sm:$0xff]  ;;  %v207_v60 = vld [vmem:[#allocation5 + $0x3c8] sm:$0xff]  ;;  %v3498_v63 = vcombine.low %v199_v50, %v203_v51 }
  0x7b   :  { %v211_v61 = vld [vmem:[#allocation5 + $0x3e8] sm:$0xff]  ;;  %v3505_v0 = vcombine.high %v206_v58, %v210_v59  ;;  %v214_v2 = vld [vmem:[#allocation5 + $0x400] sm:$0xff] }
  0x7c   :  { %2468 = vmatpush1.bf16.msra.mxu0 %v3440_v4  ;;  %2591 = vmatpush1.bf16.msra.mxu1 %v3442_v5  ;;  %v3507_v1 = vcombine.high %v207_v60, %v211_v61  ;;  %v218_v3 = vld [vmem:[#allocation5 + $0x420] sm:$0xff]  ;;  %v215_v4 = vld [vmem:[#allocation5 + $0x408] sm:$0xff] }
  0x7d   :  { %2469 = vmatprep.subr.bf16.mxu0 %v3449_v6  ;;  %2592 = vmatprep.subr.bf16.mxu1 %v3451_v7  ;;  %v219_v5 = vld [vmem:[#allocation5 + $0x428] sm:$0xff]  ;;  %v3504_v6 = vcombine.low %v206_v58, %v210_v59  ;;  %v3506_v7 = vcombine.low %v207_v60, %v211_v61  ;;  %v3513_v8 = vcombine.high %v214_v2, %v218_v3  ;;  %v222_v10 = vld [vmem:[#allocation5 + $0x440] sm:$0xff] }
  0x7e   :  { %v3515_v9 = vcombine.high %v215_v4, %v219_v5  ;;  %v226_v11 = vld [vmem:[#allocation5 + $0x460] sm:$0xff]  ;;  %v3512_v16 = vcombine.low %v214_v2, %v218_v3  ;;  %v3514_v17 = vcombine.low %v215_v4, %v219_v5 }
  0x7f   :  { %v3521_v18 = vcombine.high %v222_v10, %v226_v11  ;;  %v3520_v24 = vcombine.low %v222_v10, %v226_v11 }
  0x80   :  { %2470 = vmatpush1.bf16.msra.mxu0 %v3448_v12  ;;  %2593 = vmatpush1.bf16.msra.mxu1 %v3450_v13  ;;  %v4343_v12 = vcombine.low %v4333_v53, %v4333_v53  ;;  %v223_v13 = vld [vmem:[#allocation5 + $0x448] sm:$0xff] }
  0x81   :  { %2471 = vmatprep.subr.bf16.mxu0 %v3457_v14  ;;  %2594 = vmatprep.subr.bf16.mxu1 %v3459_v15  ;;  %v227_v14 = vld [vmem:[#allocation5 + $0x468] sm:$0xff]  ;;  %v4345_v15 = vld [vmem:[#allocation2 + $0x8] sm:$0xff] }
  0x82   :  { %v3523_v19 = vcombine.high %v223_v13, %v227_v14  ;;  %v231_v53 = vld [vmem:[#allocation5 + $0x488] sm:$0xff]  ;;  %v3522_v25 = vcombine.low %v223_v13, %v227_v14 }
  0x84   :  { %2472 = vmatpush1.bf16.msra.mxu0 %v3456_v20  ;;  %2595 = vmatpush1.bf16.msra.mxu1 %v3458_v21  ;;  %v230_v20 = vld [vmem:[#allocation5 + $0x480] sm:$0xff] }
  0x85   :  { %2473 = vmatprep.subr.bf16.mxu0 %v3465_v22  ;;  %2596 = vmatprep.subr.bf16.mxu1 %v3467_v23  ;;  %v234_v21 = vld [vmem:[#allocation5 + $0x4a0] sm:$0xff]  ;;  %v4349_v22 = vcombine.high %v4345_v15, %v4345_v15  ;;  %v235_v23 = vld [vmem:[#allocation5 + $0x4a8] sm:$0xff] }
  0x86   :  { %v3529_v26 = vcombine.high %v230_v20, %v234_v21  ;;  %v3531_v27 = vcombine.high %v231_v53, %v235_v23  ;;  %v3528_v32 = vcombine.low %v230_v20, %v234_v21  ;;  %v3530_v33 = vcombine.low %v231_v53, %v235_v23 }
  0x88   :  { %2474 = vmatpush1.bf16.msra.mxu0 %v3464_v28  ;;  %2597 = vmatpush1.bf16.msra.mxu1 %v3466_v29  ;;  %v238_v28 = vld [vmem:[#allocation5 + $0x4c0] sm:$0xff] }
  0x89   :  { %2475 = vmatprep.subr.bf16.mxu0 %v3473_v30  ;;  %2598 = vmatprep.subr.bf16.mxu1 %v3475_v31  ;;  %v242_v29 = vld [vmem:[#allocation5 + $0x4e0] sm:$0xff]  ;;  %v239_v30 = vld [vmem:[#allocation5 + $0x4c8] sm:$0xff] }
  0x8a   :  { %v243_v31 = vld [vmem:[#allocation5 + $0x4e8] sm:$0xff]  ;;  %v3537_v34 = vcombine.high %v238_v28, %v242_v29  ;;  %v3536_v40 = vcombine.low %v238_v28, %v242_v29 }
  0x8b   :  { %v3539_v35 = vcombine.high %v239_v30, %v243_v31  ;;  %v3538_v41 = vcombine.low %v239_v30, %v243_v31 }
  0x8c   :  { %2476 = vmatpush1.bf16.msra.mxu0 %v3472_v36  ;;  %2599 = vmatpush1.bf16.msra.mxu1 %v3474_v37  ;;  %v246_v36 = vld [vmem:[#allocation5 + $0x500] sm:$0xff] }
  0x8d   :  { %2477 = vmatprep.subr.bf16.mxu0 %v3481_v38  ;;  %2600 = vmatprep.subr.bf16.mxu1 %v3483_v39  ;;  %v250_v37 = vld [vmem:[#allocation5 + $0x520] sm:$0xff]  ;;  %v247_v38 = vld [vmem:[#allocation5 + $0x508] sm:$0xff] }
  0x8e   :  { %v251_v39 = vld [vmem:[#allocation5 + $0x528] sm:$0xff]  ;;  %v3545_v42 = vcombine.high %v246_v36, %v250_v37  ;;  %v3544_v48 = vcombine.low %v246_v36, %v250_v37 }
  0x8f   :  { %v3547_v43 = vcombine.high %v247_v38, %v251_v39  ;;  %v3546_v49 = vcombine.low %v247_v38, %v251_v39 }
  0x90   :  { %2478 = vmatpush1.bf16.msra.mxu0 %v3480_v44  ;;  %2601 = vmatpush1.bf16.msra.mxu1 %v3482_v45  ;;  %v254_v44 = vld [vmem:[#allocation5 + $0x540] sm:$0xff] }
  0x91   :  { %2479 = vmatprep.subr.bf16.mxu0 %v3489_v46  ;;  %2602 = vmatprep.subr.bf16.mxu1 %v3491_v47  ;;  %v258_v45 = vld [vmem:[#allocation5 + $0x560] sm:$0xff]  ;;  %v255_v46 = vld [vmem:[#allocation5 + $0x548] sm:$0xff] }
  0x92   :  { %v259_v47 = vld [vmem:[#allocation5 + $0x568] sm:$0xff]  ;;  %v3553_v50 = vcombine.high %v254_v44, %v258_v45  ;;  %v3552_v58 = vcombine.low %v254_v44, %v258_v45 }
  0x93   :  { %v3555_v51 = vcombine.high %v255_v46, %v259_v47  ;;  %v3554_v59 = vcombine.low %v255_v46, %v259_v47 }
  0x94   :  { %2480 = vmatpush1.bf16.msra.mxu0 %v3488_v52  ;;  %2603 = vmatpush1.bf16.msra.mxu1 %v3490_v54  ;;  %v262_v52 = vld [vmem:[#allocation5 + $0x580] sm:$0xff] }
  0x95   :  { %2481 = vmatprep.subr.bf16.mxu0 %v3497_v55  ;;  %2604 = vmatprep.subr.bf16.mxu1 %v3499_v56  ;;  %v266_v54 = vld [vmem:[#allocation5 + $0x5a0] sm:$0xff]  ;;  %v263_v55 = vld [vmem:[#allocation5 + $0x588] sm:$0xff] }
  0x96   :  { %v267_v56 = vld [vmem:[#allocation5 + $0x5a8] sm:$0xff]  ;;  %v3561_v60 = vcombine.high %v262_v52, %v266_v54  ;;  %v3560_v2 = vcombine.low %v262_v52, %v266_v54 }
  0x97   :  { %v3563_v61 = vcombine.high %v263_v55, %v267_v56  ;;  %v3562_v3 = vcombine.low %v263_v55, %v267_v56 }
  0x98   :  { %2482 = vmatpush1.bf16.msra.mxu0 %v3496_v62  ;;  %2605 = vmatpush1.bf16.msra.mxu1 %v3498_v63  ;;  %v270_v62 = vld [vmem:[#allocation5 + $0x5c0] sm:$0xff] }
  0x99   :  { %2483 = vmatprep.subr.bf16.mxu0 %v3505_v0  ;;  %2606 = vmatprep.subr.bf16.mxu1 %v3507_v1  ;;  %v274_v63 = vld [vmem:[#allocation5 + $0x5e0] sm:$0xff]  ;;  %v271_v0 = vld [vmem:[#allocation5 + $0x5c8] sm:$0xff] }
  0x9a   :  { %v275_v1 = vld [vmem:[#allocation5 + $0x5e8] sm:$0xff]  ;;  %v3569_v4 = vcombine.high %v270_v62, %v274_v63  ;;  %v3568_v10 = vcombine.low %v270_v62, %v274_v63 }
  0x9b   :  { %v3571_v5 = vcombine.high %v271_v0, %v275_v1  ;;  %v3570_v11 = vcombine.low %v271_v0, %v275_v1 }
  0x9c   :  { %2484 = vmatpush1.bf16.msra.mxu0 %v3504_v6  ;;  %2607 = vmatpush1.bf16.msra.mxu1 %v3506_v7  ;;  %v278_v6 = vld [vmem:[#allocation5 + $0x600] sm:$0xff] }
  0x9d   :  { %2494 = vmatprep.subr.bf16.mxu0 %v3513_v8  ;;  %2617 = vmatprep.subr.bf16.mxu1 %v3515_v9  ;;  %v282_v7 = vld [vmem:[#allocation5 + $0x620] sm:$0xff]  ;;  %v279_v8 = vld [vmem:[#allocation5 + $0x608] sm:$0xff] }
  0x9e   :  { %v283_v9 = vld [vmem:[#allocation5 + $0x628] sm:$0xff]  ;;  %v3577_v13 = vcombine.high %v278_v6, %v282_v7  ;;  %v3576_v20 = vcombine.low %v278_v6, %v282_v7 }
  0x9f   :  { %2486 = vmatmul.mubr.bf16.vlgmr.msra.gmra.mrb[0].mxu0 %v4343_v12  ;;  %2609 = vmatmul.mubr.bf16.vlgmr.msra.gmra.mrb[0].mxu1 %v4343_v12  ;;  %v3579_v14 = vcombine.high %v279_v8, %v283_v9  ;;  %v3578_v21 = vcombine.low %v279_v8, %v283_v9 }
  0xa0   :  { %2495 = vmatpush1.bf16.msra.mxu0 %v3512_v16  ;;  %2618 = vmatpush1.bf16.msra.mxu1 %v3514_v17  ;;  %v286_v16 = vld [vmem:[#allocation5 + $0x640] sm:$0xff] }
  0xa1   :  { %2496 = vmatprep.subr.bf16.mxu0 %v3521_v18  ;;  %2619 = vmatprep.subr.bf16.mxu1 %v3523_v19  ;;  %v290_v17 = vld [vmem:[#allocation5 + $0x660] sm:$0xff]  ;;  %v287_v18 = vld [vmem:[#allocation5 + $0x648] sm:$0xff] }
  0xa2   :  { %2526 = vmatprep.mubr.bf16.mxu0 %v4349_v22  ;;  %2649 = vmatprep.mubr.bf16.mxu1 %v4349_v22  ;;  %v291_v19 = vld [vmem:[#allocation5 + $0x668] sm:$0xff]  ;;  %v3585_v53 = vcombine.high %v286_v16, %v290_v17  ;;  %v3584_v28 = vcombine.low %v286_v16, %v290_v17 }
  0xa3   :  { %v3587_v23 = vcombine.high %v287_v18, %v291_v19  ;;  %v3586_v29 = vcombine.low %v287_v18, %v291_v19 }
  0xa4   :  { %2497 = vmatpush1.bf16.msra.mxu0 %v3520_v24  ;;  %2620 = vmatpush1.bf16.msra.mxu1 %v3522_v25  ;;  %v294_v24 = vld [vmem:[#allocation5 + $0x680] sm:$0xff] }
  0xa5   :  { %2498 = vmatprep.subr.bf16.mxu0 %v3529_v26  ;;  %2621 = vmatprep.subr.bf16.mxu1 %v3531_v27  ;;  %v298_v25 = vld [vmem:[#allocation5 + $0x6a0] sm:$0xff]  ;;  %v295_v26 = vld [vmem:[#allocation5 + $0x688] sm:$0xff] }
  0xa6   :  { %v299_v27 = vld [vmem:[#allocation5 + $0x6a8] sm:$0xff]  ;;  %v3593_v30 = vcombine.high %v294_v24, %v298_v25  ;;  %v3592_v36 = vcombine.low %v294_v24, %v298_v25  ;;  %v4359_v25 = vld [vmem:[#allocation2 + $0x10] sm:$0xff] }
  0xa7   :  { %v3595_v31 = vcombine.high %v295_v26, %v299_v27  ;;  %v3594_v37 = vcombine.low %v295_v26, %v299_v27  ;;  %v355_v24 = vld [vmem:[#allocation5 + $0x868] sm:$0xff] }
  0xa8   :  { %2499 = vmatpush1.bf16.msra.mxu0 %v3528_v32  ;;  %2622 = vmatpush1.bf16.msra.mxu1 %v3530_v33  ;;  %v302_v32 = vld [vmem:[#allocation5 + $0x6c0] sm:$0xff] }
  0xa9   :  { %2500 = vmatprep.subr.bf16.mxu0 %v3537_v34  ;;  %2623 = vmatprep.subr.bf16.mxu1 %v3539_v35  ;;  %v306_v33 = vld [vmem:[#allocation5 + $0x6e0] sm:$0xff]  ;;  %v303_v34 = vld [vmem:[#allocation5 + $0x6c8] sm:$0xff] }
  0xaa   :  { %v307_v35 = vld [vmem:[#allocation5 + $0x6e8] sm:$0xff]  ;;  %v3601_v38 = vcombine.high %v302_v32, %v306_v33  ;;  %v3600_v44 = vcombine.low %v302_v32, %v306_v33  ;;  %v4363_v32 = vcombine.high %v4359_v25, %v4359_v25 }
  0xab   :  { %v3603_v39 = vcombine.high %v303_v34, %v307_v35  ;;  %v3602_v45 = vcombine.low %v303_v34, %v307_v35  ;;  %v363_v33 = vld [vmem:[#allocation5 + $0x8a8] sm:$0xff] }
  0xac   :  { %2501 = vmatpush1.bf16.msra.mxu0 %v3536_v40  ;;  %2624 = vmatpush1.bf16.msra.mxu1 %v3538_v41  ;;  %v310_v40 = vld [vmem:[#allocation5 + $0x700] sm:$0xff] }
  0xad   :  { %2502 = vmatprep.subr.bf16.mxu0 %v3545_v42  ;;  %2625 = vmatprep.subr.bf16.mxu1 %v3547_v43  ;;  %v314_v41 = vld [vmem:[#allocation5 + $0x720] sm:$0xff]  ;;  %v311_v42 = vld [vmem:[#allocation5 + $0x708] sm:$0xff] }
  0xae   :  { %v315_v43 = vld [vmem:[#allocation5 + $0x728] sm:$0xff]  ;;  %v3609_v46 = vcombine.high %v310_v40, %v314_v41  ;;  %v3608_v52 = vcombine.low %v310_v40, %v314_v41 }
  0xaf   :  { %v3611_v47 = vcombine.high %v311_v42, %v315_v43  ;;  %v3610_v54 = vcombine.low %v311_v42, %v315_v43  ;;  %v367_v40 = vld [vmem:[#allocation5 + $0x8c8] sm:$0xff] }
  0xb0   :  { %2503 = vmatpush1.bf16.msra.mxu0 %v3544_v48  ;;  %2626 = vmatpush1.bf16.msra.mxu1 %v3546_v49  ;;  %v318_v48 = vld [vmem:[#allocation5 + $0x740] sm:$0xff]  ;;  %v371_v41 = vld [vmem:[#allocation5 + $0x8e8] sm:$0xff] }
  0xb1   :  { %2504 = vmatprep.subr.bf16.mxu0 %v3553_v50  ;;  %2627 = vmatprep.subr.bf16.mxu1 %v3555_v51  ;;  %v322_v49 = vld [vmem:[#allocation5 + $0x760] sm:$0xff]  ;;  %v319_v50 = vld [vmem:[#allocation5 + $0x748] sm:$0xff] }
  0xb2   :  { %v323_v51 = vld [vmem:[#allocation5 + $0x768] sm:$0xff]  ;;  %v3617_v55 = vcombine.high %v318_v48, %v322_v49  ;;  %v3616_v62 = vcombine.low %v318_v48, %v322_v49 }
  0xb3   :  { %v3619_v56 = vcombine.high %v319_v50, %v323_v51  ;;  %v3618_v63 = vcombine.low %v319_v50, %v323_v51  ;;  %v375_v48 = vld [vmem:[#allocation5 + $0x908] sm:$0xff]  ;;  %v3666_v51 = vcombine.low %v367_v40, %v371_v41 }
  0xb4   :  { %2505 = vmatpush1.bf16.msra.mxu0 %v3552_v58  ;;  %2628 = vmatpush1.bf16.msra.mxu1 %v3554_v59  ;;  %v326_v58 = vld [vmem:[#allocation5 + $0x780] sm:$0xff]  ;;  %v379_v49 = vld [vmem:[#allocation5 + $0x928] sm:$0xff] }
  0xb5   :  { %2506 = vmatprep.subr.bf16.mxu0 %v3561_v60  ;;  %2629 = vmatprep.subr.bf16.mxu1 %v3563_v61  ;;  %v330_v59 = vld [vmem:[#allocation5 + $0x7a0] sm:$0xff]  ;;  %v327_v60 = vld [vmem:[#allocation5 + $0x788] sm:$0xff] }
  0xb6   :  { %v331_v61 = vld [vmem:[#allocation5 + $0x7a8] sm:$0xff]  ;;  %v3625_v0 = vcombine.high %v326_v58, %v330_v59  ;;  %v3624_v6 = vcombine.low %v326_v58, %v330_v59 }
  0xb7   :  { %v3627_v1 = vcombine.high %v327_v60, %v331_v61  ;;  %v3626_v7 = vcombine.low %v327_v60, %v331_v61  ;;  %v383_v58 = vld [vmem:[#allocation5 + $0x948] sm:$0xff]  ;;  %v3674_v61 = vcombine.low %v375_v48, %v379_v49 }
  0xb8   :  { %2507 = vmatpush1.bf16.msra.mxu0 %v3560_v2  ;;  %2630 = vmatpush1.bf16.msra.mxu1 %v3562_v3  ;;  %v334_v2 = vld [vmem:[#allocation5 + $0x7c0] sm:$0xff]  ;;  %v387_v59 = vld [vmem:[#allocation5 + $0x968] sm:$0xff] }
  0xb9   :  { %2508 = vmatprep.subr.bf16.mxu0 %v3569_v4  ;;  %2631 = vmatprep.subr.bf16.mxu1 %v3571_v5  ;;  %v338_v3 = vld [vmem:[#allocation5 + $0x7e0] sm:$0xff]  ;;  %v335_v4 = vld [vmem:[#allocation5 + $0x7c8] sm:$0xff] }
  0xba   :  { %v339_v5 = vld [vmem:[#allocation5 + $0x7e8] sm:$0xff]  ;;  %v3633_v8 = vcombine.high %v334_v2, %v338_v3  ;;  %v3632_v16 = vcombine.low %v334_v2, %v338_v3 }
  0xbb   :  { %v3635_v9 = vcombine.high %v335_v4, %v339_v5  ;;  %v3634_v17 = vcombine.low %v335_v4, %v339_v5  ;;  %v391_v2 = vld [vmem:[#allocation5 + $0x988] sm:$0xff]  ;;  %v3682_v5 = vcombine.low %v383_v58, %v387_v59 }
  0xbc   :  { %2509 = vmatpush1.bf16.msra.mxu0 %v3568_v10  ;;  %2632 = vmatpush1.bf16.msra.mxu1 %v3570_v11  ;;  %v342_v10 = vld [vmem:[#allocation5 + $0x800] sm:$0xff]  ;;  %v395_v3 = vld [vmem:[#allocation5 + $0x9a8] sm:$0xff] }
  0xbd   :  { %2510 = vmatprep.subr.bf16.mxu0 %v3577_v13  ;;  %2633 = vmatprep.subr.bf16.mxu1 %v3579_v14  ;;  %v346_v11 = vld [vmem:[#allocation5 + $0x820] sm:$0xff]  ;;  %v343_v13 = vld [vmem:[#allocation5 + $0x808] sm:$0xff] }
  0xbe   :  { %v347_v14 = vld [vmem:[#allocation5 + $0x828] sm:$0xff]  ;;  %v3641_v18 = vcombine.high %v342_v10, %v346_v11  ;;  %v3640_v26 = vcombine.low %v342_v10, %v346_v11 }
  0xbf   :  { %v3643_v19 = vcombine.high %v343_v13, %v347_v14  ;;  %v3642_v27 = vcombine.low %v343_v13, %v347_v14  ;;  %v399_v10 = vld [vmem:[#allocation5 + $0x9c8] sm:$0xff]  ;;  %v3690_v14 = vcombine.low %v391_v2, %v395_v3 }
  0xc0   :  { %2511 = vmatpush1.bf16.msra.mxu0 %v3576_v20  ;;  %2634 = vmatpush1.bf16.msra.mxu1 %v3578_v21  ;;  %v350_v20 = vld [vmem:[#allocation5 + $0x840] sm:$0xff]  ;;  %v403_v11 = vld [vmem:[#allocation5 + $0x9e8] sm:$0xff] }
  0xc1   :  { %2512 = vmatprep.subr.bf16.mxu0 %v3585_v53  ;;  %2635 = vmatprep.subr.bf16.mxu1 %v3587_v23  ;;  %v354_v21 = vld [vmem:[#allocation5 + $0x860] sm:$0xff]  ;;  %v4357_v53 = vcombine.low %v4345_v15, %v4345_v15  ;;  %v351_v23 = vld [vmem:[#allocation5 + $0x848] sm:$0xff] }
  0xc2   :  { %v359_v15 = vld [vmem:[#allocation5 + $0x888] sm:$0xff]  ;;  %v3648_v34 = vcombine.low %v350_v20, %v354_v21  ;;  %v3650_v35 = vcombine.low %v351_v23, %v355_v24 }
  0xc3   :  { %v3658_v43 = vcombine.low %v359_v15, %v363_v33 }
  0xc4   :  { %2513 = vmatpush1.bf16.msra.mxu0 %v3584_v28  ;;  %2636 = vmatpush1.bf16.msra.mxu1 %v3586_v29  ;;  %v3649_v28 = vcombine.high %v350_v20, %v354_v21  ;;  %v3651_v29 = vcombine.high %v351_v23, %v355_v24  ;;  %v407_v20 = vld [vmem:[#allocation5 + $0xa08] sm:$0xff]  ;;  %v3698_v24 = vcombine.low %v399_v10, %v403_v11 }
  0xc5   :  { %2514 = vmatprep.subr.bf16.mxu0 %v3593_v30  ;;  %2637 = vmatprep.subr.bf16.mxu1 %v3595_v31  ;;  %v358_v30 = vld [vmem:[#allocation5 + $0x880] sm:$0xff]  ;;  %v411_v21 = vld [vmem:[#allocation5 + $0xa28] sm:$0xff] }
  0xc6   :  { %v362_v31 = vld [vmem:[#allocation5 + $0x8a0] sm:$0xff] }
  0xc7   :  { %v3656_v42 = vcombine.low %v358_v30, %v362_v31 }
  0xc8   :  { %2515 = vmatpush1.bf16.msra.mxu0 %v3592_v36  ;;  %2638 = vmatpush1.bf16.msra.mxu1 %v3594_v37  ;;  %v3657_v36 = vcombine.high %v358_v30, %v362_v31  ;;  %v3659_v37 = vcombine.high %v359_v15, %v363_v33  ;;  %v415_v30 = vld [vmem:[#allocation5 + $0xa48] sm:$0xff]  ;;  %v3706_v33 = vcombine.low %v407_v20, %v411_v21 }
  0xc9   :  { %2516 = vmatprep.subr.bf16.mxu0 %v3601_v38  ;;  %2639 = vmatprep.subr.bf16.mxu1 %v3603_v39  ;;  %v366_v38 = vld [vmem:[#allocation5 + $0x8c0] sm:$0xff]  ;;  %v419_v31 = vld [vmem:[#allocation5 + $0xa68] sm:$0xff] }
  0xca   :  { %v370_v39 = vld [vmem:[#allocation5 + $0x8e0] sm:$0xff] }
  0xcb   :  { %v3664_v50 = vcombine.low %v366_v38, %v370_v39 }
  0xcc   :  { %2517 = vmatpush1.bf16.msra.mxu0 %v3600_v44  ;;  %2640 = vmatpush1.bf16.msra.mxu1 %v3602_v45  ;;  %v3665_v44 = vcombine.high %v366_v38, %v370_v39  ;;  %v3667_v45 = vcombine.high %v367_v40, %v371_v41  ;;  %v423_v38 = vld [vmem:[#allocation5 + $0xa88] sm:$0xff]  ;;  %v3714_v41 = vcombine.low %v415_v30, %v419_v31 }
  0xcd   :  { %2518 = vmatprep.subr.bf16.mxu0 %v3609_v46  ;;  %2641 = vmatprep.subr.bf16.mxu1 %v3611_v47  ;;  %v374_v46 = vld [vmem:[#allocation5 + $0x900] sm:$0xff]  ;;  %v427_v39 = vld [vmem:[#allocation5 + $0xaa8] sm:$0xff] }
  0xce   :  { %v378_v47 = vld [vmem:[#allocation5 + $0x920] sm:$0xff] }
  0xcf   :  { %v3672_v60 = vcombine.low %v374_v46, %v378_v47 }
  0xd0   :  { %2519 = vmatpush1.bf16.msra.mxu0 %v3608_v52  ;;  %2642 = vmatpush1.bf16.msra.mxu1 %v3610_v54  ;;  %v3673_v52 = vcombine.high %v374_v46, %v378_v47  ;;  %v3675_v54 = vcombine.high %v375_v48, %v379_v49  ;;  %v431_v46 = vld [vmem:[#allocation5 + $0xac8] sm:$0xff]  ;;  %v3722_v49 = vcombine.low %v423_v38, %v427_v39 }
  0xd1   :  { %2520 = vmatprep.subr.bf16.mxu0 %v3617_v55  ;;  %2643 = vmatprep.subr.bf16.mxu1 %v3619_v56  ;;  %v382_v55 = vld [vmem:[#allocation5 + $0x940] sm:$0xff]  ;;  %v435_v47 = vld [vmem:[#allocation5 + $0xae8] sm:$0xff] }
  0xd2   :  { %v386_v56 = vld [vmem:[#allocation5 + $0x960] sm:$0xff] }
  0xd3   :  { %v3680_v4 = vcombine.low %v382_v55, %v386_v56 }
  0xd4   :  { %2521 = vmatpush1.bf16.msra.mxu0 %v3616_v62  ;;  %2644 = vmatpush1.bf16.msra.mxu1 %v3618_v63  ;;  %v3681_v62 = vcombine.high %v382_v55, %v386_v56  ;;  %v3683_v63 = vcombine.high %v383_v58, %v387_v59  ;;  %v439_v55 = vld [vmem:[#allocation5 + $0xb08] sm:$0xff]  ;;  %v3730_v59 = vcombine.low %v431_v46, %v435_v47 }
  0xd5   :  { %2522 = vmatprep.subr.bf16.mxu0 %v3625_v0  ;;  %2645 = vmatprep.subr.bf16.mxu1 %v3627_v1  ;;  %v390_v0 = vld [vmem:[#allocation5 + $0x980] sm:$0xff]  ;;  %v443_v56 = vld [vmem:[#allocation5 + $0xb28] sm:$0xff] }
  0xd6   :  { %v394_v1 = vld [vmem:[#allocation5 + $0x9a0] sm:$0xff] }
  0xd7   :  { %v3688_v13 = vcombine.low %v390_v0, %v394_v1 }
  0xd8   :  { %2523 = vmatpush1.bf16.msra.mxu0 %v3624_v6  ;;  %2646 = vmatpush1.bf16.msra.mxu1 %v3626_v7  ;;  %v3689_v6 = vcombine.high %v390_v0, %v394_v1  ;;  %v3691_v7 = vcombine.high %v391_v2, %v395_v3  ;;  %v447_v0 = vld [vmem:[#allocation5 + $0xb48] sm:$0xff]  ;;  %v3738_v3 = vcombine.low %v439_v55, %v443_v56 }
  0xd9   :  { %2524 = vmatprep.subr.bf16.mxu0 %v3633_v8  ;;  %2647 = vmatprep.subr.bf16.mxu1 %v3635_v9  ;;  %v398_v8 = vld [vmem:[#allocation5 + $0x9c0] sm:$0xff]  ;;  %v451_v1 = vld [vmem:[#allocation5 + $0xb68] sm:$0xff] }
  0xda   :  { %v402_v9 = vld [vmem:[#allocation5 + $0x9e0] sm:$0xff] }
  0xdb   :  { %v3696_v23 = vcombine.low %v398_v8, %v402_v9 }
  0xdc   :  { %2525 = vmatpush1.bf16.msra.mxu0 %v3632_v16  ;;  %2648 = vmatpush1.bf16.msra.mxu1 %v3634_v17  ;;  %v3697_v16 = vcombine.high %v398_v8, %v402_v9  ;;  %v3699_v17 = vcombine.high %v399_v10, %v403_v11  ;;  %v455_v8 = vld [vmem:[#allocation5 + $0xb88] sm:$0xff]  ;;  %v3746_v11 = vcombine.low %v447_v0, %v451_v1 }
  0xdd   :  { %2535 = vmatprep.subr.bf16.mxu0 %v3641_v18  ;;  %2658 = vmatprep.subr.bf16.mxu1 %v3643_v19  ;;  %v406_v18 = vld [vmem:[#allocation5 + $0xa00] sm:$0xff]  ;;  %v459_v9 = vld [vmem:[#allocation5 + $0xba8] sm:$0xff] }
  0xde   :  { %v410_v19 = vld [vmem:[#allocation5 + $0xa20] sm:$0xff] }
  0xdf   :  { %2527 = vmatmul.mubr.bf16.vlgmr.msra.gmra.mrb[0].mxu0 %v4357_v53  ;;  %2650 = vmatmul.mubr.bf16.vlgmr.msra.gmra.mrb[0].mxu1 %v4357_v53  ;;  %v3704_v15 = vcombine.low %v406_v18, %v410_v19 }
  0xe0   :  { %2536 = vmatpush1.bf16.msra.mxu0 %v3640_v26  ;;  %2659 = vmatpush1.bf16.msra.mxu1 %v3642_v27  ;;  %v3705_v26 = vcombine.high %v406_v18, %v410_v19  ;;  %v3707_v27 = vcombine.high %v407_v20, %v411_v21  ;;  %v463_v18 = vld [vmem:[#allocation5 + $0xbc8] sm:$0xff]  ;;  %v3754_v21 = vcombine.low %v455_v8, %v459_v9 }
  0xe1   :  { %2537 = vmatprep.subr.bf16.mxu0 %v3649_v28  ;;  %2660 = vmatprep.subr.bf16.mxu1 %v3651_v29  ;;  %v414_v28 = vld [vmem:[#allocation5 + $0xa40] sm:$0xff]  ;;  %v467_v19 = vld [vmem:[#allocation5 + $0xbe8] sm:$0xff] }
  0xe2   :  { %2567 = vmatprep.mubr.bf16.mxu0 %v4363_v32  ;;  %2690 = vmatprep.mubr.bf16.mxu1 %v4363_v32  ;;  %v418_v29 = vld [vmem:[#allocation5 + $0xa60] sm:$0xff] }
  0xe3   :  { %v3712_v40 = vcombine.low %v414_v28, %v418_v29 }
  0xe4   :  { %2538 = vmatpush1.bf16.msra.mxu0 %v3648_v34  ;;  %2661 = vmatpush1.bf16.msra.mxu1 %v3650_v35  ;;  %v3713_v34 = vcombine.high %v414_v28, %v418_v29  ;;  %v3715_v35 = vcombine.high %v415_v30, %v419_v31  ;;  %v89_v28 = vld [vmem:[#allocation5 + $0x18] sm:$0xff]  ;;  %v3762_v31 = vcombine.low %v463_v18, %v467_v19 }
  0xe5   :  { %2539 = vmatprep.subr.bf16.mxu0 %v3657_v36  ;;  %2662 = vmatprep.subr.bf16.mxu1 %v3659_v37  ;;  %v422_v36 = vld [vmem:[#allocation5 + $0xa80] sm:$0xff]  ;;  %v93_v29 = vld [vmem:[#allocation5 + $0x38] sm:$0xff] }
  0xe6   :  { %v426_v37 = vld [vmem:[#allocation5 + $0xaa0] sm:$0xff] }
  0xe7   :  { %v3720_v48 = vcombine.low %v422_v36, %v426_v37 }
  0xe8   :  { %2540 = vmatpush1.bf16.msra.mxu0 %v3656_v42  ;;  %2663 = vmatpush1.bf16.msra.mxu1 %v3658_v43  ;;  %v3721_v42 = vcombine.high %v422_v36, %v426_v37  ;;  %v3723_v43 = vcombine.high %v423_v38, %v427_v39  ;;  %v4371_v36 = vcombine.low %v4359_v25, %v4359_v25  ;;  %v97_v37 = vld [vmem:[#allocation5 + $0x58] sm:$0xff] }
  0xe9   :  { %2541 = vmatprep.subr.bf16.mxu0 %v3665_v44  ;;  %2664 = vmatprep.subr.bf16.mxu1 %v3667_v45  ;;  %v430_v44 = vld [vmem:[#allocation5 + $0xac0] sm:$0xff]  ;;  %v101_v38 = vld [vmem:[#allocation5 + $0x78] sm:$0xff] }
  0xea   :  { %v434_v45 = vld [vmem:[#allocation5 + $0xae0] sm:$0xff] }
  0xeb   :  { %v3728_v58 = vcombine.low %v430_v44, %v434_v45 }
  0xec   :  { %2542 = vmatpush1.bf16.msra.mxu0 %v3664_v50  ;;  %2665 = vmatpush1.bf16.msra.mxu1 %v3666_v51  ;;  %v3729_v50 = vcombine.high %v430_v44, %v434_v45  ;;  %v3731_v51 = vcombine.high %v431_v46, %v435_v47  ;;  %v108_v44 = vld [vmem:[#allocation5 + $0xb0] sm:$0xff]  ;;  %v105_v45 = vld [vmem:[#allocation5 + $0x98] sm:$0xff]  ;;  %v3398_v47 = vcombine.low %v97_v37, %v101_v38 }
  0xed   :  { %2543 = vmatprep.subr.bf16.mxu0 %v3673_v52  ;;  %2666 = vmatprep.subr.bf16.mxu1 %v3675_v54  ;;  %v438_v52 = vld [vmem:[#allocation5 + $0xb00] sm:$0xff]  ;;  %v109_v46 = vld [vmem:[#allocation5 + $0xb8] sm:$0xff] }
  0xee   :  { %v442_v54 = vld [vmem:[#allocation5 + $0xb20] sm:$0xff] }
  0xef   :  { %v3736_v2 = vcombine.low %v438_v52, %v442_v54 }
  0xf0   :  { %2544 = vmatpush1.bf16.msra.mxu0 %v3672_v60  ;;  %2667 = vmatpush1.bf16.msra.mxu1 %v3674_v61  ;;  %v3737_v60 = vcombine.high %v438_v52, %v442_v54  ;;  %v3739_v61 = vcombine.high %v439_v55, %v443_v56  ;;  %v113_v52 = vld [vmem:[#allocation5 + $0xd8] sm:$0xff]  ;;  %v3406_v56 = vcombine.low %v105_v45, %v109_v46 }
  0xf1   :  { %2545 = vmatprep.subr.bf16.mxu0 %v3681_v62  ;;  %2668 = vmatprep.subr.bf16.mxu1 %v3683_v63  ;;  %v446_v62 = vld [vmem:[#allocation5 + $0xb40] sm:$0xff]  ;;  %v117_v54 = vld [vmem:[#allocation5 + $0xf8] sm:$0xff] }
  0xf2   :  { %v450_v63 = vld [vmem:[#allocation5 + $0xb60] sm:$0xff] }
  0xf3   :  { %v3744_v10 = vcombine.low %v446_v62, %v450_v63 }
  0xf4   :  { %2546 = vmatpush1.bf16.msra.mxu0 %v3680_v4  ;;  %2669 = vmatpush1.bf16.msra.mxu1 %v3682_v5  ;;  %v3745_v4 = vcombine.high %v446_v62, %v450_v63  ;;  %v3747_v5 = vcombine.high %v447_v0, %v451_v1  ;;  %v121_v62 = vld [vmem:[#allocation5 + $0x118] sm:$0xff]  ;;  %v3414_v1 = vcombine.low %v113_v52, %v117_v54 }
  0xf5   :  { %2547 = vmatprep.subr.bf16.mxu0 %v3689_v6  ;;  %2670 = vmatprep.subr.bf16.mxu1 %v3691_v7  ;;  %v454_v6 = vld [vmem:[#allocation5 + $0xb80] sm:$0xff]  ;;  %v125_v63 = vld [vmem:[#allocation5 + $0x138] sm:$0xff] }
  0xf6   :  { %v458_v7 = vld [vmem:[#allocation5 + $0xba0] sm:$0xff] }
  0xf7   :  { %v3752_v20 = vcombine.low %v454_v6, %v458_v7 }
  0xf8   :  { %2548 = vmatpush1.bf16.msra.mxu0 %v3688_v13  ;;  %2671 = vmatpush1.bf16.msra.mxu1 %v3690_v14  ;;  %v3753_v13 = vcombine.high %v454_v6, %v458_v7  ;;  %v3755_v14 = vcombine.high %v455_v8, %v459_v9  ;;  %v133_v6 = vld [vmem:[#allocation5 + $0x178] sm:$0xff]  ;;  %v3422_v8 = vcombine.low %v121_v62, %v125_v63 }
  0xf9   :  { %2549 = vmatprep.subr.bf16.mxu0 %v3697_v16  ;;  %2672 = vmatprep.subr.bf16.mxu1 %v3699_v17  ;;  %v462_v16 = vld [vmem:[#allocation5 + $0xbc0] sm:$0xff] }
  0xfa   :  { %v466_v17 = vld [vmem:[#allocation5 + $0xbe0] sm:$0xff] }
  0xfb   :  { %v3760_v30 = vcombine.low %v462_v16, %v466_v17 }
  0xfc   :  { %2550 = vmatpush1.bf16.msra.mxu0 %v3696_v23  ;;  %2673 = vmatpush1.bf16.msra.mxu1 %v3698_v24  ;;  %v3761_v23 = vcombine.high %v462_v16, %v466_v17  ;;  %v3763_v24 = vcombine.high %v463_v18, %v467_v19  ;;  %v141_v16 = vld [vmem:[#allocation5 + $0x1b8] sm:$0xff] }
  0xfd   :  { %2551 = vmatprep.subr.bf16.mxu0 %v3705_v26  ;;  %2674 = vmatprep.subr.bf16.mxu1 %v3707_v27  ;;  %v88_v26 = vld [vmem:[#allocation5 + $0x10] sm:$0xff] }
  0xfe   :  { %v92_v27 = vld [vmem:[#allocation5 + $0x30] sm:$0xff] }
  0xff   :  { %v3388_v39 = vcombine.low %v88_v26, %v92_v27 }
 0x100   :  { %2552 = vmatpush1.bf16.msra.mxu0 %v3704_v15  ;;  %2675 = vmatpush1.bf16.msra.mxu1 %v3706_v33  ;;  %v3389_v15 = vcombine.high %v88_v26, %v92_v27  ;;  %v3391_v33 = vcombine.high %v89_v28, %v93_v29  ;;  %v149_v26 = vld [vmem:[#allocation5 + $0x1f8] sm:$0xff] }
 0x101   :  { %2553 = vmatprep.subr.bf16.mxu0 %v3713_v34  ;;  %2676 = vmatprep.subr.bf16.mxu1 %v3715_v35  ;;  %v96_v34 = vld [vmem:[#allocation5 + $0x50] sm:$0xff] }
 0x102   :  { %v100_v35 = vld [vmem:[#allocation5 + $0x70] sm:$0xff] }
 0x103   :  { %v3396_v25 = vcombine.low %v96_v34, %v100_v35 }
 0x104   :  { %2554 = vmatpush1.bf16.msra.mxu0 %v3712_v40  ;;  %2677 = vmatpush1.bf16.msra.mxu1 %v3714_v41  ;;  %v3390_v40 = vcombine.low %v89_v28, %v93_v29  ;;  %v3397_v41 = vcombine.high %v96_v34, %v100_v35  ;;  %v157_v34 = vld [vmem:[#allocation5 + $0x238] sm:$0xff] }
 0x105   :  { %2555 = vmatprep.subr.bf16.mxu0 %v3721_v42  ;;  %2678 = vmatprep.subr.bf16.mxu1 %v3723_v43  ;;  %v3399_v42 = vcombine.high %v97_v37, %v101_v38  ;;  %v104_v43 = vld [vmem:[#allocation5 + $0x90] sm:$0xff] }
 0x106   :  { %v3404_v55 = vcombine.low %v104_v43, %v108_v44 }
 0x108   :  { %2556 = vmatpush1.bf16.msra.mxu0 %v3720_v48  ;;  %2679 = vmatpush1.bf16.msra.mxu1 %v3722_v49  ;;  %v3405_v48 = vcombine.high %v104_v43, %v108_v44  ;;  %v3407_v49 = vcombine.high %v105_v45, %v109_v46  ;;  %v165_v43 = vld [vmem:[#allocation5 + $0x278] sm:$0xff] }
 0x109   :  { %2557 = vmatprep.subr.bf16.mxu0 %v3729_v50  ;;  %2680 = vmatprep.subr.bf16.mxu1 %v3731_v51  ;;  %v112_v50 = vld [vmem:[#allocation5 + $0xd0] sm:$0xff] }
 0x10a   :  { %v116_v51 = vld [vmem:[#allocation5 + $0xf0] sm:$0xff] }
 0x10b   :  { %v3412_v0 = vcombine.low %v112_v50, %v116_v51 }
 0x10c   :  { %2558 = vmatpush1.bf16.msra.mxu0 %v3728_v58  ;;  %2681 = vmatpush1.bf16.msra.mxu1 %v3730_v59  ;;  %v3413_v58 = vcombine.high %v112_v50, %v116_v51  ;;  %v3415_v59 = vcombine.high %v113_v52, %v117_v54  ;;  %v173_v50 = vld [vmem:[#allocation5 + $0x2b8] sm:$0xff] }
 0x10d   :  { %2559 = vmatprep.subr.bf16.mxu0 %v3737_v60  ;;  %2682 = vmatprep.subr.bf16.mxu1 %v3739_v61  ;;  %v120_v60 = vld [vmem:[#allocation5 + $0x110] sm:$0xff] }
 0x10e   :  { %v124_v61 = vld [vmem:[#allocation5 + $0x130] sm:$0xff] }
 0x10f   :  { %v3420_v7 = vcombine.low %v120_v60, %v124_v61 }
 0x110   :  { %2560 = vmatpush1.bf16.msra.mxu0 %v3736_v2  ;;  %2683 = vmatpush1.bf16.msra.mxu1 %v3738_v3  ;;  %v3421_v2 = vcombine.high %v120_v60, %v124_v61  ;;  %v128_v3 = vld [vmem:[#allocation5 + $0x150] sm:$0xff]  ;;  %v181_v60 = vld [vmem:[#allocation5 + $0x2f8] sm:$0xff] }
 0x111   :  { %2561 = vmatprep.subr.bf16.mxu0 %v3745_v4  ;;  %2684 = vmatprep.subr.bf16.mxu1 %v3747_v5  ;;  %v132_v4 = vld [vmem:[#allocation5 + $0x170] sm:$0xff]  ;;  %v129_v5 = vld [vmem:[#allocation5 + $0x158] sm:$0xff] }
 0x112   :  { %v3429_v9 = vcombine.high %v128_v3, %v132_v4  ;;  %v3428_v17 = vcombine.low %v128_v3, %v132_v4  ;;  %v3430_v18 = vcombine.low %v129_v5, %v133_v6  ;;  %v189_v3 = vld [vmem:[#allocation5 + $0x338] sm:$0xff] }
 0x114   :  { %2562 = vmatpush1.bf16.msra.mxu0 %v3744_v10  ;;  %2685 = vmatpush1.bf16.msra.mxu1 %v3746_v11  ;;  %v3431_v10 = vcombine.high %v129_v5, %v133_v6  ;;  %v136_v11 = vld [vmem:[#allocation5 + $0x190] sm:$0xff] }
 0x115   :  { %2563 = vmatprep.subr.bf16.mxu0 %v3753_v13  ;;  %2686 = vmatprep.subr.bf16.mxu1 %v3755_v14  ;;  %v140_v13 = vld [vmem:[#allocation5 + $0x1b0] sm:$0xff]  ;;  %v137_v14 = vld [vmem:[#allocation5 + $0x198] sm:$0xff] }
 0x116   :  { %v3437_v19 = vcombine.high %v136_v11, %v140_v13  ;;  %v3436_v27 = vcombine.low %v136_v11, %v140_v13  ;;  %v3438_v28 = vcombine.low %v137_v14, %v141_v16  ;;  %v197_v11 = vld [vmem:[#allocation5 + $0x378] sm:$0xff] }
 0x118   :  { %2564 = vmatpush1.bf16.msra.mxu0 %v3752_v20  ;;  %2687 = vmatpush1.bf16.msra.mxu1 %v3754_v21  ;;  %v3439_v20 = vcombine.high %v137_v14, %v141_v16  ;;  %v144_v21 = vld [vmem:[#allocation5 + $0x1d0] sm:$0xff] }
 0x119   :  { %2565 = vmatprep.subr.bf16.mxu0 %v3761_v23  ;;  %2688 = vmatprep.subr.bf16.mxu1 %v3763_v24  ;;  %v148_v23 = vld [vmem:[#allocation5 + $0x1f0] sm:$0xff]  ;;  %v145_v24 = vld [vmem:[#allocation5 + $0x1d8] sm:$0xff] }
 0x11a   :  { %v3445_v29 = vcombine.high %v144_v21, %v148_v23  ;;  %v3444_v35 = vcombine.low %v144_v21, %v148_v23  ;;  %v3446_v37 = vcombine.low %v145_v24, %v149_v26  ;;  %v205_v21 = vld [vmem:[#allocation5 + $0x3b8] sm:$0xff] }
 0x11c   :  { %2566 = vmatpush1.bf16.msra.mxu0 %v3760_v30  ;;  %2689 = vmatpush1.bf16.msra.mxu1 %v3762_v31  ;;  %v3447_v30 = vcombine.high %v145_v24, %v149_v26  ;;  %v152_v31 = vld [vmem:[#allocation5 + $0x210] sm:$0xff] }
 0x11d   :  { %2699 = vmatprep.subr.bf16.mxu0 %v3389_v15  ;;  %2822 = vmatprep.subr.bf16.mxu1 %v3391_v33  ;;  %v156_v15 = vld [vmem:[#allocation5 + $0x230] sm:$0xff]  ;;  %v153_v33 = vld [vmem:[#allocation5 + $0x218] sm:$0xff] }
 0x11e   :  { %v3453_v38 = vcombine.high %v152_v31, %v156_v15  ;;  %v3452_v44 = vcombine.low %v152_v31, %v156_v15  ;;  %v3454_v45 = vcombine.low %v153_v33, %v157_v34  ;;  %v213_v31 = vld [vmem:[#allocation5 + $0x3f8] sm:$0xff] }
 0x11f   :  { %2568 = vmatmul.mubr.bf16.vlgmr.msra.gmra.mrb[0].mxu0 %v4371_v36  ;;  %2691 = vmatmul.mubr.bf16.vlgmr.msra.gmra.mrb[0].mxu1 %v4371_v36 }
 0x120   :  { %2700 = vmatpush1.bf16.msra.mxu0 %v3388_v39  ;;  %2823 = vmatpush1.bf16.msra.mxu1 %v3390_v40  ;;  %v3455_v39 = vcombine.high %v153_v33, %v157_v34  ;;  %v160_v40 = vld [vmem:[#allocation5 + $0x250] sm:$0xff] }
 0x121   :  { %2701 = vmatprep.subr.bf16.mxu0 %v3397_v41  ;;  %2824 = vmatprep.subr.bf16.mxu1 %v3399_v42  ;;  %v164_v41 = vld [vmem:[#allocation5 + $0x270] sm:$0xff]  ;;  %v161_v42 = vld [vmem:[#allocation5 + $0x258] sm:$0xff] }
 0x122   :  { %2731 = vmatprep.mubr.bf16.mxu0 %v4337_v57  ;;  %2854 = vmatprep.mubr.bf16.mxu1 %v4337_v57  ;;  %v3423_v57 = vcombine.high %v121_v62, %v125_v63  ;;  %v3461_v46 = vcombine.high %v160_v40, %v164_v41  ;;  %v3460_v51 = vcombine.low %v160_v40, %v164_v41  ;;  %v221_v40 = vld [vmem:[#allocation5 + $0x438] sm:$0xff] }
 0x123   :  { %v3462_v52 = vcombine.low %v161_v42, %v165_v43 }
 0x124   :  { %2702 = vmatpush1.bf16.msra.mxu0 %v3396_v25  ;;  %2825 = vmatpush1.bf16.msra.mxu1 %v3398_v47  ;;  %v3463_v25 = vcombine.high %v161_v42, %v165_v43  ;;  %v168_v47 = vld [vmem:[#allocation5 + $0x290] sm:$0xff] }
 0x125   :  { %2703 = vmatprep.subr.bf16.mxu0 %v3405_v48  ;;  %2826 = vmatprep.subr.bf16.mxu1 %v3407_v49  ;;  %v172_v48 = vld [vmem:[#allocation5 + $0x2b0] sm:$0xff]  ;;  %v169_v49 = vld [vmem:[#allocation5 + $0x298] sm:$0xff] }
 0x126   :  { %v3469_v54 = vcombine.high %v168_v47, %v172_v48  ;;  %v3468_v61 = vcombine.low %v168_v47, %v172_v48  ;;  %v3470_v62 = vcombine.low %v169_v49, %v173_v50  ;;  %v229_v47 = vld [vmem:[#allocation5 + $0x478] sm:$0xff] }
 0x128   :  { %2704 = vmatpush1.bf16.msra.mxu0 %v3404_v55  ;;  %2827 = vmatpush1.bf16.msra.mxu1 %v3406_v56  ;;  %v3471_v55 = vcombine.high %v169_v49, %v173_v50  ;;  %v176_v56 = vld [vmem:[#allocation5 + $0x2d0] sm:$0xff] }
 0x129   :  { %2705 = vmatprep.subr.bf16.mxu0 %v3413_v58  ;;  %2828 = vmatprep.subr.bf16.mxu1 %v3415_v59  ;;  %v180_v58 = vld [vmem:[#allocation5 + $0x2f0] sm:$0xff]  ;;  %v177_v59 = vld [vmem:[#allocation5 + $0x2d8] sm:$0xff] }
 0x12a   :  { %v3477_v63 = vcombine.high %v176_v56, %v180_v58  ;;  %v3476_v4 = vcombine.low %v176_v56, %v180_v58  ;;  %v3478_v5 = vcombine.low %v177_v59, %v181_v60  ;;  %v237_v56 = vld [vmem:[#allocation5 + $0x4b8] sm:$0xff] }
 0x12c   :  { %2706 = vmatpush1.bf16.msra.mxu0 %v3412_v0  ;;  %2829 = vmatpush1.bf16.msra.mxu1 %v3414_v1  ;;  %v3479_v0 = vcombine.high %v177_v59, %v181_v60  ;;  %v184_v1 = vld [vmem:[#allocation5 + $0x310] sm:$0xff] }
 0x12d   :  { %2707 = vmatprep.subr.bf16.mxu0 %v3421_v2  ;;  %2830 = vmatprep.subr.bf16.mxu1 %v3423_v57  ;;  %v188_v2 = vld [vmem:[#allocation5 + $0x330] sm:$0xff]  ;;  %v185_v57 = vld [vmem:[#allocation5 + $0x318] sm:$0xff] }
 0x12e   :  { %v3485_v6 = vcombine.high %v184_v1, %v188_v2  ;;  %v3484_v13 = vcombine.low %v184_v1, %v188_v2  ;;  %v3486_v14 = vcombine.low %v185_v57, %v189_v3  ;;  %v245_v1 = vld [vmem:[#allocation5 + $0x4f8] sm:$0xff] }
 0x130   :  { %2708 = vmatpush1.bf16.msra.mxu0 %v3420_v7  ;;  %2831 = vmatpush1.bf16.msra.mxu1 %v3422_v8  ;;  %v3487_v7 = vcombine.high %v185_v57, %v189_v3  ;;  %v192_v8 = vld [vmem:[#allocation5 + $0x350] sm:$0xff] }
 0x131   :  { %2709 = vmatprep.subr.bf16.mxu0 %v3429_v9  ;;  %2832 = vmatprep.subr.bf16.mxu1 %v3431_v10  ;;  %v196_v9 = vld [vmem:[#allocation5 + $0x370] sm:$0xff]  ;;  %v193_v10 = vld [vmem:[#allocation5 + $0x358] sm:$0xff] }
 0x132   :  { %v3493_v16 = vcombine.high %v192_v8, %v196_v9  ;;  %v3492_v23 = vcombine.low %v192_v8, %v196_v9  ;;  %v3494_v24 = vcombine.low %v193_v10, %v197_v11 }
 0x134   :  { %2710 = vmatpush1.bf16.msra.mxu0 %v3428_v17  ;;  %2833 = vmatpush1.bf16.msra.mxu1 %v3430_v18  ;;  %v3495_v17 = vcombine.high %v193_v10, %v197_v11  ;;  %v200_v18 = vld [vmem:[#allocation5 + $0x390] sm:$0xff] }
 0x135   :  { %2711 = vmatprep.subr.bf16.mxu0 %v3437_v19  ;;  %2834 = vmatprep.subr.bf16.mxu1 %v3439_v20  ;;  %v204_v19 = vld [vmem:[#allocation5 + $0x3b0] sm:$0xff]  ;;  %v201_v20 = vld [vmem:[#allocation5 + $0x398] sm:$0xff] }
 0x136   :  { %v3501_v26 = vcombine.high %v200_v18, %v204_v19  ;;  %v3500_v15 = vcombine.low %v200_v18, %v204_v19  ;;  %v3502_v33 = vcombine.low %v201_v20, %v205_v21  ;;  %v256_v11 = vld [vmem:[#allocation5 + $0x550] sm:$0xff] }
 0x138   :  { %2712 = vmatpush1.bf16.msra.mxu0 %v3436_v27  ;;  %2835 = vmatpush1.bf16.msra.mxu1 %v3438_v28  ;;  %v3503_v27 = vcombine.high %v201_v20, %v205_v21  ;;  %v208_v28 = vld [vmem:[#allocation5 + $0x3d0] sm:$0xff] }
 0x139   :  { %2713 = vmatprep.subr.bf16.mxu0 %v3445_v29  ;;  %2836 = vmatprep.subr.bf16.mxu1 %v3447_v30  ;;  %v212_v29 = vld [vmem:[#allocation5 + $0x3f0] sm:$0xff]  ;;  %v209_v30 = vld [vmem:[#allocation5 + $0x3d8] sm:$0xff] }
 0x13a   :  { %v3509_v34 = vcombine.high %v208_v28, %v212_v29  ;;  %v3508_v41 = vcombine.low %v208_v28, %v212_v29  ;;  %v3510_v42 = vcombine.low %v209_v30, %v213_v31  ;;  %v264_v21 = vld [vmem:[#allocation5 + $0x590] sm:$0xff] }
 0x13c   :  { %2714 = vmatpush1.bf16.msra.mxu0 %v3444_v35  ;;  %2837 = vmatpush1.bf16.msra.mxu1 %v3446_v37  ;;  %v3511_v35 = vcombine.high %v209_v30, %v213_v31  ;;  %v216_v37 = vld [vmem:[#allocation5 + $0x410] sm:$0xff] }
 0x13d   :  { %2715 = vmatprep.subr.bf16.mxu0 %v3453_v38  ;;  %2838 = vmatprep.subr.bf16.mxu1 %v3455_v39  ;;  %v220_v38 = vld [vmem:[#allocation5 + $0x430] sm:$0xff]  ;;  %v217_v39 = vld [vmem:[#allocation5 + $0x418] sm:$0xff] }
 0x13e   :  { %v3517_v43 = vcombine.high %v216_v37, %v220_v38  ;;  %v3516_v48 = vcombine.low %v216_v37, %v220_v38  ;;  %v3518_v49 = vcombine.low %v217_v39, %v221_v40  ;;  %v272_v31 = vld [vmem:[#allocation5 + $0x5d0] sm:$0xff] }
 0x140   :  { %2716 = vmatpush1.bf16.msra.mxu0 %v3452_v44  ;;  %2839 = vmatpush1.bf16.msra.mxu1 %v3454_v45  ;;  %v3519_v44 = vcombine.high %v217_v39, %v221_v40  ;;  %v224_v45 = vld [vmem:[#allocation5 + $0x450] sm:$0xff] }
 0x141   :  { %2717 = vmatprep.subr.bf16.mxu0 %v3461_v46  ;;  %2840 = vmatprep.subr.bf16.mxu1 %v3463_v25  ;;  %v228_v46 = vld [vmem:[#allocation5 + $0x470] sm:$0xff]  ;;  %v225_v25 = vld [vmem:[#allocation5 + $0x458] sm:$0xff] }
 0x142   :  { %v3525_v50 = vcombine.high %v224_v45, %v228_v46  ;;  %v3524_v58 = vcombine.low %v224_v45, %v228_v46  ;;  %v3526_v59 = vcombine.low %v225_v25, %v229_v47  ;;  %v280_v40 = vld [vmem:[#allocation5 + $0x610] sm:$0xff] }
 0x144   :  { %2718 = vmatpush1.bf16.msra.mxu0 %v3460_v51  ;;  %2841 = vmatpush1.bf16.msra.mxu1 %v3462_v52  ;;  %v3527_v51 = vcombine.high %v225_v25, %v229_v47  ;;  %v232_v52 = vld [vmem:[#allocation5 + $0x490] sm:$0xff] }
 0x145   :  { %2719 = vmatprep.subr.bf16.mxu0 %v3469_v54  ;;  %2842 = vmatprep.subr.bf16.mxu1 %v3471_v55  ;;  %v236_v54 = vld [vmem:[#allocation5 + $0x4b0] sm:$0xff]  ;;  %v233_v55 = vld [vmem:[#allocation5 + $0x498] sm:$0xff] }
 0x146   :  { %v3533_v60 = vcombine.high %v232_v52, %v236_v54  ;;  %v3532_v2 = vcombine.low %v232_v52, %v236_v54  ;;  %v288_v47 = vld [vmem:[#allocation5 + $0x650] sm:$0xff] }
 0x148   :  { %2720 = vmatpush1.bf16.msra.mxu0 %v3468_v61  ;;  %2843 = vmatpush1.bf16.msra.mxu1 %v3470_v62  ;;  %v3535_v61 = vcombine.high %v233_v55, %v237_v56  ;;  %v240_v62 = vld [vmem:[#allocation5 + $0x4d0] sm:$0xff] }
 0x149   :  { %2721 = vmatprep.subr.bf16.mxu0 %v3477_v63  ;;  %2844 = vmatprep.subr.bf16.mxu1 %v3479_v0  ;;  %v244_v63 = vld [vmem:[#allocation5 + $0x4f0] sm:$0xff]  ;;  %v241_v0 = vld [vmem:[#allocation5 + $0x4d8] sm:$0xff] }
 0x14a   :  { %v3541_v57 = vcombine.high %v240_v62, %v244_v63  ;;  %v3543_v3 = vcombine.high %v241_v0, %v245_v1  ;;  %v3540_v8 = vcombine.low %v240_v62, %v244_v63  ;;  %v3542_v9 = vcombine.low %v241_v0, %v245_v1  ;;  %v304_v1 = vld [vmem:[#allocation5 + $0x6d0] sm:$0xff] }
 0x14c   :  { %2722 = vmatpush1.bf16.msra.mxu0 %v3476_v4  ;;  %2845 = vmatpush1.bf16.msra.mxu1 %v3478_v5  ;;  %v248_v4 = vld [vmem:[#allocation5 + $0x510] sm:$0xff] }
 0x14d   :  { %2723 = vmatprep.subr.bf16.mxu0 %v3485_v6  ;;  %2846 = vmatprep.subr.bf16.mxu1 %v3487_v7  ;;  %v252_v5 = vld [vmem:[#allocation5 + $0x530] sm:$0xff]  ;;  %v249_v6 = vld [vmem:[#allocation5 + $0x518] sm:$0xff] }
 0x14e   :  { %v253_v7 = vld [vmem:[#allocation5 + $0x538] sm:$0xff]  ;;  %v3549_v10 = vcombine.high %v248_v4, %v252_v5 }
 0x14f   :  { %v3550_v18 = vcombine.low %v249_v6, %v253_v7 }
 0x150   :  { %2724 = vmatpush1.bf16.msra.mxu0 %v3484_v13  ;;  %2847 = vmatpush1.bf16.msra.mxu1 %v3486_v14  ;;  %v260_v13 = vld [vmem:[#allocation5 + $0x570] sm:$0xff]  ;;  %v257_v14 = vld [vmem:[#allocation5 + $0x558] sm:$0xff] }
 0x151   :  { %2725 = vmatprep.subr.bf16.mxu0 %v3493_v16  ;;  %2848 = vmatprep.subr.bf16.mxu1 %v3495_v17  ;;  %v261_v16 = vld [vmem:[#allocation5 + $0x578] sm:$0xff]  ;;  %v3548_v17 = vcombine.low %v248_v4, %v252_v5  ;;  %v3557_v19 = vcombine.high %v256_v11, %v260_v13 }
 0x152   :  { %v3559_v20 = vcombine.high %v257_v14, %v261_v16  ;;  %v3558_v28 = vcombine.low %v257_v14, %v261_v16  ;;  %v320_v16 = vld [vmem:[#allocation5 + $0x750] sm:$0xff] }
 0x154   :  { %2726 = vmatpush1.bf16.msra.mxu0 %v3492_v23  ;;  %2849 = vmatpush1.bf16.msra.mxu1 %v3494_v24  ;;  %v268_v23 = vld [vmem:[#allocation5 + $0x5b0] sm:$0xff]  ;;  %v265_v24 = vld [vmem:[#allocation5 + $0x598] sm:$0xff] }
 0x155   :  { %2727 = vmatprep.subr.bf16.mxu0 %v3501_v26  ;;  %2850 = vmatprep.subr.bf16.mxu1 %v3503_v27  ;;  %v269_v26 = vld [vmem:[#allocation5 + $0x5b8] sm:$0xff]  ;;  %v3556_v27 = vcombine.low %v256_v11, %v260_v13  ;;  %v3565_v29 = vcombine.high %v264_v21, %v268_v23 }
 0x156   :  { %v3567_v30 = vcombine.high %v265_v24, %v269_v26  ;;  %v3566_v37 = vcombine.low %v265_v24, %v269_v26  ;;  %v328_v26 = vld [vmem:[#allocation5 + $0x790] sm:$0xff] }
 0x158   :  { %2728 = vmatpush1.bf16.msra.mxu0 %v3500_v15  ;;  %2851 = vmatpush1.bf16.msra.mxu1 %v3502_v33  ;;  %v276_v15 = vld [vmem:[#allocation5 + $0x5f0] sm:$0xff]  ;;  %v273_v33 = vld [vmem:[#allocation5 + $0x5d8] sm:$0xff] }
 0x159   :  { %2729 = vmatprep.subr.bf16.mxu0 %v3509_v34  ;;  %2852 = vmatprep.subr.bf16.mxu1 %v3511_v35  ;;  %v277_v34 = vld [vmem:[#allocation5 + $0x5f8] sm:$0xff]  ;;  %v3564_v35 = vcombine.low %v264_v21, %v268_v23  ;;  %v3573_v38 = vcombine.high %v272_v31, %v276_v15 }
 0x15a   :  { %v3575_v39 = vcombine.high %v273_v33, %v277_v34  ;;  %v3574_v45 = vcombine.low %v273_v33, %v277_v34  ;;  %v336_v34 = vld [vmem:[#allocation5 + $0x7d0] sm:$0xff] }
 0x15c   :  { %2730 = vmatpush1.bf16.msra.mxu0 %v3508_v41  ;;  %2853 = vmatpush1.bf16.msra.mxu1 %v3510_v42  ;;  %v284_v41 = vld [vmem:[#allocation5 + $0x630] sm:$0xff]  ;;  %v281_v42 = vld [vmem:[#allocation5 + $0x618] sm:$0xff] }
 0x15d   :  { %2740 = vmatprep.subr.bf16.mxu0 %v3517_v43  ;;  %2863 = vmatprep.subr.bf16.mxu1 %v3519_v44  ;;  %v285_v43 = vld [vmem:[#allocation5 + $0x638] sm:$0xff]  ;;  %v3572_v44 = vcombine.low %v272_v31, %v276_v15  ;;  %v3581_v46 = vcombine.high %v280_v40, %v284_v41 }
 0x15e   :  { %v3583_v25 = vcombine.high %v281_v42, %v285_v43  ;;  %v3582_v52 = vcombine.low %v281_v42, %v285_v43  ;;  %v344_v43 = vld [vmem:[#allocation5 + $0x810] sm:$0xff] }
 0x15f   :  { %2732 = vmatmul.mubr.bf16.vlgmr.msra.gmra.mrb[4].mxu0 %v4343_v12  ;;  %2855 = vmatmul.mubr.bf16.vlgmr.msra.gmra.mrb[4].mxu1 %v4343_v12  ;;  %v3534_v12 = vcombine.low %v233_v55, %v237_v56  ;;  %v296_v56 = vld [vmem:[#allocation5 + $0x690] sm:$0xff] }
 0x160   :  { %2741 = vmatpush1.bf16.msra.mxu0 %v3516_v48  ;;  %2864 = vmatpush1.bf16.msra.mxu1 %v3518_v49  ;;  %v292_v48 = vld [vmem:[#allocation5 + $0x670] sm:$0xff]  ;;  %v289_v49 = vld [vmem:[#allocation5 + $0x658] sm:$0xff] }
 0x161   :  { %2742 = vmatprep.subr.bf16.mxu0 %v3525_v50  ;;  %2865 = vmatprep.subr.bf16.mxu1 %v3527_v51  ;;  %v293_v50 = vld [vmem:[#allocation5 + $0x678] sm:$0xff]  ;;  %v3580_v51 = vcombine.low %v280_v40, %v284_v41  ;;  %v3589_v54 = vcombine.high %v288_v47, %v292_v48 }
 0x162   :  { %2772 = vmatprep.mubr.bf16.mxu0 %v4349_v22  ;;  %2895 = vmatprep.mubr.bf16.mxu1 %v4349_v22  ;;  %v3551_v22 = vcombine.high %v249_v6, %v253_v7  ;;  %v3591_v55 = vcombine.high %v289_v49, %v293_v50  ;;  %v3590_v62 = vcombine.low %v289_v49, %v293_v50  ;;  %v312_v7 = vld [vmem:[#allocation5 + $0x710] sm:$0xff] }
 0x163   :  { %v352_v50 = vld [vmem:[#allocation5 + $0x850] sm:$0xff] }
 0x164   :  { %2743 = vmatpush1.bf16.msra.mxu0 %v3524_v58  ;;  %2866 = vmatpush1.bf16.msra.mxu1 %v3526_v59  ;;  %v300_v58 = vld [vmem:[#allocation5 + $0x6b0] sm:$0xff]  ;;  %v297_v59 = vld [vmem:[#allocation5 + $0x698] sm:$0xff] }
 0x165   :  { %2744 = vmatprep.subr.bf16.mxu0 %v3533_v60  ;;  %2867 = vmatprep.subr.bf16.mxu1 %v3535_v61  ;;  %v301_v60 = vld [vmem:[#allocation5 + $0x6b8] sm:$0xff]  ;;  %v3588_v61 = vcombine.low %v288_v47, %v292_v48  ;;  %v3597_v63 = vcombine.high %v296_v56, %v300_v58 }
 0x166   :  { %v3599_v0 = vcombine.high %v297_v59, %v301_v60  ;;  %v3598_v4 = vcombine.low %v297_v59, %v301_v60  ;;  %v360_v60 = vld [vmem:[#allocation5 + $0x890] sm:$0xff] }
 0x168   :  { %2745 = vmatpush1.bf16.msra.mxu0 %v3532_v2  ;;  %2868 = vmatpush1.bf16.msra.mxu1 %v3534_v12  ;;  %v308_v2 = vld [vmem:[#allocation5 + $0x6f0] sm:$0xff]  ;;  %v305_v12 = vld [vmem:[#allocation5 + $0x6d8] sm:$0xff] }
 0x169   :  { %2746 = vmatprep.subr.bf16.mxu0 %v3541_v57  ;;  %2869 = vmatprep.subr.bf16.mxu1 %v3543_v3  ;;  %v309_v57 = vld [vmem:[#allocation5 + $0x6f8] sm:$0xff]  ;;  %v3596_v3 = vcombine.low %v296_v56, %v300_v58  ;;  %v3605_v5 = vcombine.high %v304_v1, %v308_v2 }
 0x16a   :  { %v3607_v6 = vcombine.high %v305_v12, %v309_v57  ;;  %v3606_v11 = vcombine.low %v305_v12, %v309_v57  ;;  %v368_v57 = vld [vmem:[#allocation5 + $0x8d0] sm:$0xff] }
 0x16c   :  { %2747 = vmatpush1.bf16.msra.mxu0 %v3540_v8  ;;  %2870 = vmatpush1.bf16.msra.mxu1 %v3542_v9  ;;  %v316_v8 = vld [vmem:[#allocation5 + $0x730] sm:$0xff]  ;;  %v313_v9 = vld [vmem:[#allocation5 + $0x718] sm:$0xff] }
 0x16d   :  { %2748 = vmatprep.subr.bf16.mxu0 %v3549_v10  ;;  %2871 = vmatprep.subr.bf16.mxu1 %v3551_v22  ;;  %v317_v10 = vld [vmem:[#allocation5 + $0x738] sm:$0xff]  ;;  %v3604_v22 = vcombine.low %v304_v1, %v308_v2  ;;  %v3613_v13 = vcombine.high %v312_v7, %v316_v8 }
 0x16e   :  { %v3615_v14 = vcombine.high %v313_v9, %v317_v10  ;;  %v3614_v21 = vcombine.low %v313_v9, %v317_v10  ;;  %v376_v9 = vld [vmem:[#allocation5 + $0x910] sm:$0xff] }
 0x16f   :  { %v380_v10 = vld [vmem:[#allocation5 + $0x930] sm:$0xff] }
 0x170   :  { %2749 = vmatpush1.bf16.msra.mxu0 %v3548_v17  ;;  %2872 = vmatpush1.bf16.msra.mxu1 %v3550_v18  ;;  %v324_v17 = vld [vmem:[#allocation5 + $0x770] sm:$0xff]  ;;  %v321_v18 = vld [vmem:[#allocation5 + $0x758] sm:$0xff] }
 0x171   :  { %2750 = vmatprep.subr.bf16.mxu0 %v3557_v19  ;;  %2873 = vmatprep.subr.bf16.mxu1 %v3559_v20  ;;  %v325_v19 = vld [vmem:[#allocation5 + $0x778] sm:$0xff]  ;;  %v3612_v20 = vcombine.low %v312_v7, %v316_v8  ;;  %v3621_v23 = vcombine.high %v320_v16, %v324_v17 }
 0x172   :  { %v3623_v24 = vcombine.high %v321_v18, %v325_v19  ;;  %v3622_v31 = vcombine.low %v321_v18, %v325_v19  ;;  %v388_v18 = vld [vmem:[#allocation5 + $0x970] sm:$0xff]  ;;  %v385_v19 = vld [vmem:[#allocation5 + $0x958] sm:$0xff] }
 0x174   :  { %2751 = vmatpush1.bf16.msra.mxu0 %v3556_v27  ;;  %2874 = vmatpush1.bf16.msra.mxu1 %v3558_v28  ;;  %v332_v27 = vld [vmem:[#allocation5 + $0x7b0] sm:$0xff]  ;;  %v329_v28 = vld [vmem:[#allocation5 + $0x798] sm:$0xff] }
 0x175   :  { %2752 = vmatprep.subr.bf16.mxu0 %v3565_v29  ;;  %2875 = vmatprep.subr.bf16.mxu1 %v3567_v30  ;;  %v333_v29 = vld [vmem:[#allocation5 + $0x7b8] sm:$0xff]  ;;  %v3620_v30 = vcombine.low %v320_v16, %v324_v17  ;;  %v3629_v15 = vcombine.high %v328_v26, %v332_v27  ;;  %v3677_v16 = vcombine.high %v376_v9, %v380_v10  ;;  %v384_v17 = vld [vmem:[#allocation5 + $0x950] sm:$0xff] }
 0x176   :  { %v3631_v33 = vcombine.high %v329_v28, %v333_v29  ;;  %v3630_v40 = vcombine.low %v329_v28, %v333_v29  ;;  %v396_v28 = vld [vmem:[#allocation5 + $0x9b0] sm:$0xff]  ;;  %v393_v29 = vld [vmem:[#allocation5 + $0x998] sm:$0xff] }
 0x178   :  { %2753 = vmatpush1.bf16.msra.mxu0 %v3564_v35  ;;  %2876 = vmatpush1.bf16.msra.mxu1 %v3566_v37  ;;  %v340_v35 = vld [vmem:[#allocation5 + $0x7f0] sm:$0xff]  ;;  %v337_v37 = vld [vmem:[#allocation5 + $0x7d8] sm:$0xff] }
 0x179   :  { %2754 = vmatprep.subr.bf16.mxu0 %v3573_v38  ;;  %2877 = vmatprep.subr.bf16.mxu1 %v3575_v39  ;;  %v341_v38 = vld [vmem:[#allocation5 + $0x7f8] sm:$0xff]  ;;  %v3628_v39 = vcombine.low %v328_v26, %v332_v27  ;;  %v3637_v41 = vcombine.high %v336_v34, %v340_v35  ;;  %v392_v27 = vld [vmem:[#allocation5 + $0x990] sm:$0xff] }
 0x17a   :  { %v3639_v42 = vcombine.high %v337_v37, %v341_v38  ;;  %v3638_v47 = vcombine.low %v337_v37, %v341_v38  ;;  %v404_v37 = vld [vmem:[#allocation5 + $0x9f0] sm:$0xff]  ;;  %v401_v38 = vld [vmem:[#allocation5 + $0x9d8] sm:$0xff] }
 0x17c   :  { %2755 = vmatpush1.bf16.msra.mxu0 %v3572_v44  ;;  %2878 = vmatpush1.bf16.msra.mxu1 %v3574_v45  ;;  %v348_v44 = vld [vmem:[#allocation5 + $0x830] sm:$0xff]  ;;  %v345_v45 = vld [vmem:[#allocation5 + $0x818] sm:$0xff] }
 0x17d   :  { %2756 = vmatprep.subr.bf16.mxu0 %v3581_v46  ;;  %2879 = vmatprep.subr.bf16.mxu1 %v3583_v25  ;;  %v349_v46 = vld [vmem:[#allocation5 + $0x838] sm:$0xff]  ;;  %v3636_v25 = vcombine.low %v336_v34, %v340_v35  ;;  %v3645_v48 = vcombine.high %v344_v43, %v348_v44  ;;  %v400_v35 = vld [vmem:[#allocation5 + $0x9d0] sm:$0xff] }
 0x17e   :  { %v3647_v49 = vcombine.high %v345_v45, %v349_v46  ;;  %v3646_v56 = vcombine.low %v345_v45, %v349_v46  ;;  %v412_v45 = vld [vmem:[#allocation5 + $0xa30] sm:$0xff]  ;;  %v409_v46 = vld [vmem:[#allocation5 + $0xa18] sm:$0xff] }
 0x180   :  { %2757 = vmatpush1.bf16.msra.mxu0 %v3580_v51  ;;  %2880 = vmatpush1.bf16.msra.mxu1 %v3582_v52  ;;  %v356_v51 = vld [vmem:[#allocation5 + $0x870] sm:$0xff]  ;;  %v353_v52 = vld [vmem:[#allocation5 + $0x858] sm:$0xff] }
 0x181   :  { %2758 = vmatprep.subr.bf16.mxu0 %v3589_v54  ;;  %2881 = vmatprep.subr.bf16.mxu1 %v3591_v55  ;;  %v357_v54 = vld [vmem:[#allocation5 + $0x878] sm:$0xff]  ;;  %v3644_v55 = vcombine.low %v344_v43, %v348_v44  ;;  %v3653_v58 = vcombine.high %v352_v50, %v356_v51  ;;  %v408_v44 = vld [vmem:[#allocation5 + $0xa10] sm:$0xff] }
 0x182   :  { %v3655_v59 = vcombine.high %v353_v52, %v357_v54  ;;  %v3654_v1 = vcombine.low %v353_v52, %v357_v54  ;;  %v420_v52 = vld [vmem:[#allocation5 + $0xa70] sm:$0xff]  ;;  %v417_v54 = vld [vmem:[#allocation5 + $0xa58] sm:$0xff] }
 0x184   :  { %2759 = vmatpush1.bf16.msra.mxu0 %v3588_v61  ;;  %2882 = vmatpush1.bf16.msra.mxu1 %v3590_v62  ;;  %v364_v61 = vld [vmem:[#allocation5 + $0x8b0] sm:$0xff]  ;;  %v361_v62 = vld [vmem:[#allocation5 + $0x898] sm:$0xff] }
 0x185   :  { %2760 = vmatprep.subr.bf16.mxu0 %v3597_v63  ;;  %2883 = vmatprep.subr.bf16.mxu1 %v3599_v0  ;;  %v365_v63 = vld [vmem:[#allocation5 + $0x8b8] sm:$0xff]  ;;  %v3652_v0 = vcombine.low %v352_v50, %v356_v51  ;;  %v3661_v2 = vcombine.high %v360_v60, %v364_v61  ;;  %v416_v51 = vld [vmem:[#allocation5 + $0xa50] sm:$0xff] }
 0x186   :  { %v3663_v12 = vcombine.high %v361_v62, %v365_v63 }
 0x188   :  { %2761 = vmatpush1.bf16.msra.mxu0 %v3596_v3  ;;  %2884 = vmatpush1.bf16.msra.mxu1 %v3598_v4  ;;  %v372_v3 = vld [vmem:[#allocation5 + $0x8f0] sm:$0xff]  ;;  %v369_v4 = vld [vmem:[#allocation5 + $0x8d8] sm:$0xff] }
 0x189   :  { %2762 = vmatprep.subr.bf16.mxu0 %v3605_v5  ;;  %2885 = vmatprep.subr.bf16.mxu1 %v3607_v6  ;;  %v373_v5 = vld [vmem:[#allocation5 + $0x8f8] sm:$0xff]  ;;  %v3660_v6 = vcombine.low %v360_v60, %v364_v61  ;;  %v3669_v7 = vcombine.high %v368_v57, %v372_v3  ;;  %v424_v61 = vld [vmem:[#allocation5 + $0xa90] sm:$0xff] }
 0x18a   :  { %v3671_v8 = vcombine.high %v369_v4, %v373_v5 }
 0x18c   :  { %2763 = vmatpush1.bf16.msra.mxu0 %v3604_v22  ;;  %2886 = vmatpush1.bf16.msra.mxu1 %v3606_v11  ;;  %v377_v22 = vld [vmem:[#allocation5 + $0x918] sm:$0xff] }
 0x18d   :  { %2764 = vmatprep.subr.bf16.mxu0 %v3613_v13  ;;  %2887 = vmatprep.subr.bf16.mxu1 %v3615_v14  ;;  %v381_v11 = vld [vmem:[#allocation5 + $0x938] sm:$0xff]  ;;  %v3668_v13 = vcombine.low %v368_v57, %v372_v3  ;;  %v3670_v14 = vcombine.low %v369_v4, %v373_v5  ;;  %v432_v3 = vld [vmem:[#allocation5 + $0xad0] sm:$0xff] }
 0x18e   :  { %v436_v4 = vld [vmem:[#allocation5 + $0xaf0] sm:$0xff]  ;;  %v433_v5 = vld [vmem:[#allocation5 + $0xad8] sm:$0xff] }
 0x190   :  { %2765 = vmatpush1.bf16.msra.mxu0 %v3612_v20  ;;  %2888 = vmatpush1.bf16.msra.mxu1 %v3614_v21  ;;  %v389_v20 = vld [vmem:[#allocation5 + $0x978] sm:$0xff]  ;;  %v3676_v21 = vcombine.low %v376_v9, %v380_v10  ;;  %v440_v10 = vld [vmem:[#allocation5 + $0xb10] sm:$0xff] }
 0x191   :  { %2766 = vmatprep.subr.bf16.mxu0 %v3621_v23  ;;  %2889 = vmatprep.subr.bf16.mxu1 %v3623_v24  ;;  %v3678_v23 = vcombine.low %v377_v22, %v381_v11  ;;  %v3685_v24 = vcombine.high %v384_v17, %v388_v18  ;;  %v3687_v26 = vcombine.high %v385_v19, %v389_v20 }
 0x194   :  { %2767 = vmatpush1.bf16.msra.mxu0 %v3620_v30  ;;  %2890 = vmatpush1.bf16.msra.mxu1 %v3622_v31  ;;  %v397_v30 = vld [vmem:[#allocation5 + $0x9b8] sm:$0xff]  ;;  %v3684_v31 = vcombine.low %v384_v17, %v388_v18  ;;  %v448_v18 = vld [vmem:[#allocation5 + $0xb50] sm:$0xff] }
 0x195   :  { %2768 = vmatprep.subr.bf16.mxu0 %v3629_v15  ;;  %2891 = vmatprep.subr.bf16.mxu1 %v3631_v33  ;;  %v3686_v15 = vcombine.low %v385_v19, %v389_v20  ;;  %v3693_v33 = vcombine.high %v392_v27, %v396_v28  ;;  %v3695_v34 = vcombine.high %v393_v29, %v397_v30  ;;  %v452_v19 = vld [vmem:[#allocation5 + $0xb70] sm:$0xff]  ;;  %v449_v20 = vld [vmem:[#allocation5 + $0xb58] sm:$0xff] }
 0x198   :  { %2769 = vmatpush1.bf16.msra.mxu0 %v3628_v39  ;;  %2892 = vmatpush1.bf16.msra.mxu1 %v3630_v40  ;;  %v405_v39 = vld [vmem:[#allocation5 + $0x9f8] sm:$0xff]  ;;  %v3692_v40 = vcombine.low %v392_v27, %v396_v28  ;;  %v456_v28 = vld [vmem:[#allocation5 + $0xb90] sm:$0xff] }
 0x199   :  { %2770 = vmatprep.subr.bf16.mxu0 %v3637_v41  ;;  %2893 = vmatprep.subr.bf16.mxu1 %v3639_v42  ;;  %v3694_v41 = vcombine.low %v393_v29, %v397_v30  ;;  %v3701_v42 = vcombine.high %v400_v35, %v404_v37  ;;  %v3703_v43 = vcombine.high %v401_v38, %v405_v39  ;;  %v460_v29 = vld [vmem:[#allocation5 + $0xbb0] sm:$0xff]  ;;  %v457_v30 = vld [vmem:[#allocation5 + $0xb98] sm:$0xff] }
 0x19c   :  { %2771 = vmatpush1.bf16.msra.mxu0 %v3636_v25  ;;  %2894 = vmatpush1.bf16.msra.mxu1 %v3638_v47  ;;  %v413_v25 = vld [vmem:[#allocation5 + $0xa38] sm:$0xff]  ;;  %v3700_v47 = vcombine.low %v400_v35, %v404_v37  ;;  %v464_v37 = vld [vmem:[#allocation5 + $0xbd0] sm:$0xff] }
 0x19d   :  { %2781 = vmatprep.subr.bf16.mxu0 %v3645_v48  ;;  %2904 = vmatprep.subr.bf16.mxu1 %v3647_v49  ;;  %v3702_v48 = vcombine.low %v401_v38, %v405_v39  ;;  %v3709_v49 = vcombine.high %v408_v44, %v412_v45  ;;  %v3711_v50 = vcombine.high %v409_v46, %v413_v25  ;;  %v468_v38 = vld [vmem:[#allocation5 + $0xbf0] sm:$0xff]  ;;  %v465_v39 = vld [vmem:[#allocation5 + $0xbd8] sm:$0xff] }
 0x19f   :  { %2773 = vmatmul.mubr.bf16.vlgmr.msra.gmra.mrb[4].mxu0 %v4357_v53  ;;  %2896 = vmatmul.mubr.bf16.vlgmr.msra.gmra.mrb[4].mxu1 %v4357_v53  ;;  %v3662_v53 = vcombine.low %v361_v62, %v365_v63  ;;  %v428_v62 = vld [vmem:[#allocation5 + $0xab0] sm:$0xff]  ;;  %v425_v63 = vld [vmem:[#allocation5 + $0xa98] sm:$0xff] }
 0x1a0   :  { %2782 = vmatpush1.bf16.msra.mxu0 %v3644_v55  ;;  %2905 = vmatpush1.bf16.msra.mxu1 %v3646_v56  ;;  %v421_v55 = vld [vmem:[#allocation5 + $0xa78] sm:$0xff]  ;;  %v3708_v56 = vcombine.low %v408_v44, %v412_v45  ;;  %v2961_v45 = vld [vmem:[#allocation8 + $0x80] sm:$0xff] }
 0x1a1   :  { %2783 = vmatprep.subr.bf16.mxu0 %v3653_v58  ;;  %2906 = vmatprep.subr.bf16.mxu1 %v3655_v59  ;;  %v3710_v58 = vcombine.low %v409_v46, %v413_v25  ;;  %v3717_v59 = vcombine.high %v416_v51, %v420_v52  ;;  %v3719_v60 = vcombine.high %v417_v54, %v421_v55  ;;  %v2962_v46 = vld [vmem:[#allocation8 + $0x88] sm:$0xff]  ;;  %v2993_v25 = vld [vmem:[#allocation8 + $0x180] sm:$0xff] }
 0x1a2   :  { %2813 = vmatprep.mubr.bf16.mxu0 %v4363_v32  ;;  %2936 = vmatprep.mubr.bf16.mxu1 %v4363_v32  ;;  %v3679_v32 = vcombine.high %v377_v22, %v381_v11  ;;  %v444_v22 = vld [vmem:[#allocation5 + $0xb30] sm:$0xff]  ;;  %v441_v11 = vld [vmem:[#allocation5 + $0xb18] sm:$0xff] }
 0x1a4   :  { %2784 = vmatpush1.bf16.msra.mxu0 %v3652_v0  ;;  %2907 = vmatpush1.bf16.msra.mxu1 %v3654_v1  ;;  %v429_v0 = vld [vmem:[#allocation5 + $0xab8] sm:$0xff]  ;;  %v3716_v1 = vcombine.low %v416_v51, %v420_v52  ;;  %v2945_v51 = vld [vmem:[#allocation8] sm:$0xff]  ;;  %v2946_v52 = vld [vmem:[#allocation8 + $0x8] sm:$0xff] }
 0x1a5   :  { %2785 = vmatprep.subr.bf16.mxu0 %v3661_v2  ;;  %2908 = vmatprep.subr.bf16.mxu1 %v3663_v12  ;;  %v3718_v2 = vcombine.low %v417_v54, %v421_v55  ;;  %v3725_v12 = vcombine.high %v424_v61, %v428_v62  ;;  %v3727_v57 = vcombine.high %v425_v63, %v429_v0  ;;  %v2977_v54 = vld [vmem:[#allocation8 + $0x100] sm:$0xff] }
 0x1a8   :  { %2786 = vmatpush1.bf16.msra.mxu0 %v3660_v6  ;;  %2909 = vmatpush1.bf16.msra.mxu1 %v3662_v53  ;;  %v437_v6 = vld [vmem:[#allocation5 + $0xaf8] sm:$0xff]  ;;  %v3724_v53 = vcombine.low %v424_v61, %v428_v62  ;;  %v2996_v61 = vld [vmem:[#allocation8 + $0x198] sm:$0xff]  ;;  %v3911_v62 = vpack.c.bf16 %v2946_v52, %v2945_v51 }
 0x1a9   :  { %2787 = vmatprep.subr.bf16.mxu0 %v3669_v7  ;;  %2910 = vmatprep.subr.bf16.mxu1 %v3671_v8  ;;  %v3726_v7 = vcombine.low %v425_v63, %v429_v0  ;;  %v3733_v8 = vcombine.high %v432_v3, %v436_v4  ;;  %v3735_v9 = vcombine.high %v433_v5, %v437_v6  ;;  %v2955_v52 = vld [vmem:[#allocation8 + $0x50] sm:$0xff] }
 0x1ac   :  { %2788 = vmatpush1.bf16.msra.mxu0 %v3668_v13  ;;  %2911 = vmatpush1.bf16.msra.mxu1 %v3670_v14  ;;  %v445_v13 = vld [vmem:[#allocation5 + $0xb38] sm:$0xff]  ;;  %v3732_v14 = vcombine.low %v432_v3, %v436_v4  ;;  %v2980_v3 = vld [vmem:[#allocation8 + $0x118] sm:$0xff]  ;;  %v2965_v4 = vld [vmem:[#allocation8 + $0xa0] sm:$0xff] }
 0x1ad   :  { %2789 = vmatprep.subr.bf16.mxu0 %v3677_v16  ;;  %2912 = vmatprep.subr.bf16.mxu1 %v3679_v32  ;;  %v3734_v16 = vcombine.low %v433_v5, %v437_v6  ;;  %v3741_v32 = vcombine.high %v440_v10, %v444_v22  ;;  %v3743_v17 = vcombine.high %v441_v11, %v445_v13  ;;  %v2966_v5 = vld [vmem:[#allocation8 + $0xa8] sm:$0xff]  ;;  %v2997_v6 = vld [vmem:[#allocation8 + $0x1a0] sm:$0xff] }
 0x1b0   :  { %2790 = vmatpush1.bf16.msra.mxu0 %v3676_v21  ;;  %2913 = vmatpush1.bf16.msra.mxu1 %v3678_v23  ;;  %v453_v21 = vld [vmem:[#allocation5 + $0xb78] sm:$0xff]  ;;  %v3740_v23 = vcombine.low %v440_v10, %v444_v22  ;;  %v2949_v10 = vld [vmem:[#allocation8 + $0x20] sm:$0xff]  ;;  %v2950_v22 = vld [vmem:[#allocation8 + $0x28] sm:$0xff] }
 0x1b1   :  { %2791 = vmatprep.subr.bf16.mxu0 %v3685_v24  ;;  %2914 = vmatprep.subr.bf16.mxu1 %v3687_v26  ;;  %v3742_v24 = vcombine.low %v441_v11, %v445_v13  ;;  %v3749_v26 = vcombine.high %v448_v18, %v452_v19  ;;  %v3751_v27 = vcombine.high %v449_v20, %v453_v21  ;;  %v2981_v11 = vld [vmem:[#allocation8 + $0x120] sm:$0xff] }
 0x1b4   :  { %2792 = vmatpush1.bf16.msra.mxu0 %v3684_v31  ;;  %2915 = vmatpush1.bf16.msra.mxu1 %v3686_v15  ;;  %v461_v31 = vld [vmem:[#allocation5 + $0xbb8] sm:$0xff]  ;;  %v3748_v15 = vcombine.low %v448_v18, %v452_v19  ;;  %v3000_v18 = vld [vmem:[#allocation8 + $0x1b8] sm:$0xff]  ;;  %v3919_v19 = vpack.c.bf16 %v2950_v22, %v2949_v10 }
 0x1b5   :  { %2793 = vmatprep.subr.bf16.mxu0 %v3693_v33  ;;  %2916 = vmatprep.subr.bf16.mxu1 %v3695_v34  ;;  %v3750_v33 = vcombine.low %v449_v20, %v453_v21  ;;  %v3757_v34 = vcombine.high %v456_v28, %v460_v29  ;;  %v3759_v35 = vcombine.high %v457_v30, %v461_v31  ;;  %v472_v20 = vlaneseq  ;;  %v3007_v22 = vld [vmem:[#allocation8 + $0x1f0] sm:$0xff] }
 0x1b8   :  { %2794 = vmatpush1.bf16.msra.mxu0 %v3692_v40  ;;  %2917 = vmatpush1.bf16.msra.mxu1 %v3694_v41  ;;  %v469_v40 = vld [vmem:[#allocation5 + $0xbf8] sm:$0xff]  ;;  %v3756_v41 = vcombine.low %v456_v28, %v460_v29  ;;  %v2984_v28 = vld [vmem:[#allocation8 + $0x138] sm:$0xff]  ;;  %v2969_v29 = vld [vmem:[#allocation8 + $0xc0] sm:$0xff] }
 0x1b9   :  { %2795 = vmatprep.subr.bf16.mxu0 %v3701_v42  ;;  %2918 = vmatprep.subr.bf16.mxu1 %v3703_v43  ;;  %v3758_v42 = vcombine.low %v457_v30, %v461_v31  ;;  %v3765_v43 = vcombine.high %v464_v37, %v468_v38  ;;  %v3767_v44 = vcombine.high %v465_v39, %v469_v40  ;;  %v2970_v30 = vld [vmem:[#allocation8 + $0xc8] sm:$0xff]  ;;  %v3001_v31 = vld [vmem:[#allocation8 + $0x1c0] sm:$0xff] }
 0x1bc   :  { %2796 = vmatpush1.bf16.msra.mxu0 %v3700_v47  ;;  %2919 = vmatpush1.bf16.msra.mxu1 %v3702_v48  ;;  %v2994_v47 = vld [vmem:[#allocation8 + $0x188] sm:$0xff]  ;;  %v3764_v48 = vcombine.low %v464_v37, %v468_v38  ;;  %v3925_v37 = vpack.c.bf16 %v2970_v30, %v2969_v29  ;;  %v2953_v38 = vld [vmem:[#allocation8 + $0x40] sm:$0xff]  ;;  %v2992_v30 = vld [vmem:[#allocation8 + $0x178] sm:$0xff] }
 0x1bd   :  { %2797 = vmatprep.subr.bf16.mxu0 %v3709_v49  ;;  %2920 = vmatprep.subr.bf16.mxu1 %v3711_v50  ;;  %v3766_v49 = vcombine.low %v465_v39, %v469_v40  ;;  %v3909_v50 = vpack.c.bf16 %v2962_v46, %v2961_v45  ;;  %v3941_v55 = vpack.c.bf16 %v2994_v47, %v2993_v25  ;;  %v2954_v39 = vld [vmem:[#allocation8 + $0x48] sm:$0xff]  ;;  %v2985_v40 = vld [vmem:[#allocation8 + $0x140] sm:$0xff]  ;;  %v3003_v45 = vld [vmem:[#allocation8 + $0x1d0] sm:$0xff] }
 0x1be   :  { %v3004_v46 = vld [vmem:[#allocation8 + $0x1d8] sm:$0xff]  ;;  %v3927_v25 = vpack.c.bf16 %v2954_v39, %v2953_v38 }
 0x1bf   :  { %v4389_v47 = vld [vmem:[#allocation7] sm:$0xff] }
 0x1c0   :  { %2798 = vmatpush1.bf16.msra.mxu0 %v3708_v56  ;;  %2921 = vmatpush1.bf16.msra.mxu1 %v3710_v58  ;;  %v2978_v56 = vld [vmem:[#allocation8 + $0x108] sm:$0xff]  ;;  %v2963_v58 = vld [vmem:[#allocation8 + $0x90] sm:$0xff] }
 0x1c1   :  { %2799 = vmatprep.subr.bf16.mxu0 %v3717_v59  ;;  %2922 = vmatprep.subr.bf16.mxu1 %v3719_v60  ;;  %v2964_v59 = vld [vmem:[#allocation8 + $0x98] sm:$0xff]  ;;  %v2995_v60 = vld [vmem:[#allocation8 + $0x190] sm:$0xff]  ;;  %v3943_v63 = vpack.c.bf16 %v2978_v56, %v2977_v54  ;;  %v3961_v56 = vpack.c.bf16 %v3004_v46, %v3003_v45  ;;  %v3042_v46 = vld [vmem:[#allocation8 + $0x308] sm:$0xff] }
 0x1c2   :  { %v3913_v0 = vpack.c.bf16 %v2964_v59, %v2963_v58  ;;  %v2956_v54 = vld [vmem:[#allocation8 + $0x58] sm:$0xff]  ;;  %v2973_v59 = vld [vmem:[#allocation8 + $0xe0] sm:$0xff] }
 0x1c3   :  { %v2988_v58 = vld [vmem:[#allocation8 + $0x158] sm:$0xff] }
 0x1c4   :  { %2800 = vmatpush1.bf16.msra.mxu0 %v3716_v1  ;;  %2923 = vmatpush1.bf16.msra.mxu1 %v3718_v2  ;;  %v2947_v1 = vld [vmem:[#allocation8 + $0x10] sm:$0xff]  ;;  %v2948_v2 = vld [vmem:[#allocation8 + $0x18] sm:$0xff] }
 0x1c5   :  { %2801 = vmatprep.subr.bf16.mxu0 %v3725_v12  ;;  %2924 = vmatprep.subr.bf16.mxu1 %v3727_v57  ;;  %v2979_v12 = vld [vmem:[#allocation8 + $0x110] sm:$0xff]  ;;  %v3945_v57 = vpack.c.bf16 %v2996_v61, %v2995_v60  ;;  %v2974_v60 = vld [vmem:[#allocation8 + $0xe8] sm:$0xff]  ;;  %v3005_v61 = vld [vmem:[#allocation8 + $0x1e0] sm:$0xff] }
 0x1c8   :  { %2802 = vmatpush1.bf16.msra.mxu0 %v3724_v53  ;;  %2925 = vmatpush1.bf16.msra.mxu1 %v3726_v7  ;;  %v2998_v53 = vld [vmem:[#allocation8 + $0x1a8] sm:$0xff]  ;;  %v3915_v7 = vpack.c.bf16 %v2948_v2, %v2947_v1 }
 0x1c9   :  { %2803 = vmatprep.subr.bf16.mxu0 %v3733_v8  ;;  %2926 = vmatprep.subr.bf16.mxu1 %v3735_v9  ;;  %v3947_v8 = vpack.c.bf16 %v2980_v3, %v2979_v12  ;;  %v3917_v9 = vpack.c.bf16 %v2966_v5, %v2965_v4  ;;  %v3949_v13 = vpack.c.bf16 %v2998_v53, %v2997_v6  ;;  %v2958_v3 = vld [vmem:[#allocation8 + $0x68] sm:$0xff]  ;;  %v2989_v4 = vld [vmem:[#allocation8 + $0x160] sm:$0xff] }
 0x1ca   :  { %v3933_v12 = vpack.c.bf16 %v2974_v60, %v2973_v59  ;;  %v2990_v53 = vld [vmem:[#allocation8 + $0x168] sm:$0xff]  ;;  %v3043_v59 = vld [vmem:[#allocation8 + $0x310] sm:$0xff] }
 0x1cc   :  { %2804 = vmatpush1.bf16.msra.mxu0 %v3732_v14  ;;  %2927 = vmatpush1.bf16.msra.mxu1 %v3734_v16  ;;  %v2982_v14 = vld [vmem:[#allocation8 + $0x128] sm:$0xff]  ;;  %v2967_v16 = vld [vmem:[#allocation8 + $0xb0] sm:$0xff] }
 0x1cd   :  { %2805 = vmatprep.subr.bf16.mxu0 %v3741_v32  ;;  %2928 = vmatprep.subr.bf16.mxu1 %v3743_v17  ;;  %v2968_v32 = vld [vmem:[#allocation8 + $0xb8] sm:$0xff]  ;;  %v2999_v17 = vld [vmem:[#allocation8 + $0x1b0] sm:$0xff] }
 0x1ce   :  { %v3921_v21 = vpack.c.bf16 %v2968_v32, %v2967_v16 }
 0x1d0   :  { %2806 = vmatpush1.bf16.msra.mxu0 %v3740_v23  ;;  %2929 = vmatpush1.bf16.msra.mxu1 %v3742_v24  ;;  %v2951_v23 = vld [vmem:[#allocation8 + $0x30] sm:$0xff]  ;;  %v2952_v24 = vld [vmem:[#allocation8 + $0x38] sm:$0xff] }
 0x1d1   :  { %2807 = vmatprep.subr.bf16.mxu0 %v3749_v26  ;;  %2930 = vmatprep.subr.bf16.mxu1 %v3751_v27  ;;  %v2983_v26 = vld [vmem:[#allocation8 + $0x130] sm:$0xff]  ;;  %v3953_v27 = vpack.c.bf16 %v3000_v18, %v2999_v17 }
 0x1d4   :  { %2808 = vmatpush1.bf16.msra.mxu0 %v3748_v15  ;;  %2931 = vmatpush1.bf16.msra.mxu1 %v3750_v33  ;;  %v3002_v15 = vld [vmem:[#allocation8 + $0x1c8] sm:$0xff]  ;;  %v3923_v33 = vpack.c.bf16 %v2952_v24, %v2951_v23  ;;  %v2959_v23 = vld [vmem:[#allocation8 + $0x70] sm:$0xff]  ;;  %v2960_v24 = vld [vmem:[#allocation8 + $0x78] sm:$0xff] }
 0x1d5   :  { %2809 = vmatprep.subr.bf16.mxu0 %v3757_v34  ;;  %2932 = vmatprep.subr.bf16.mxu1 %v3759_v35  ;;  %v4387_v34 = vshrl.u32 %v472_v20, 7  ;;  %v3955_v35 = vpack.c.bf16 %v2984_v28, %v2983_v26  ;;  %v2991_v26 = vld [vmem:[#allocation8 + $0x170] sm:$0xff] }
 0x1d6   :  { %v3971_v39 = vpack.c.bf16 %v2992_v30, %v2991_v26  ;;  %v3049_v30 = vld [vmem:[#allocation8 + $0x340] sm:$0xff] }
 0x1d7   :  { %v474_v17 = vsub.s32 0, %v4387_v34 }
 0x1d8   :  { %2810 = vmatpush1.bf16.msra.mxu0 %v3756_v41  ;;  %2933 = vmatpush1.bf16.msra.mxu1 %v3758_v42  ;;  %v3957_v41 = vpack.c.bf16 %v3002_v15, %v3001_v31  ;;  %v2986_v42 = vld [vmem:[#allocation8 + $0x148] sm:$0xff]  ;;  %v3025_v31 = vld [vmem:[#allocation8 + $0x280] sm:$0xff] }
 0x1d9   :  { %2811 = vmatprep.subr.bf16.mxu0 %v3765_v43  ;;  %2934 = vmatprep.subr.bf16.mxu1 %v3767_v44  ;;  %v2971_v43 = vld [vmem:[#allocation8 + $0xd0] sm:$0xff]  ;;  %v2972_v44 = vld [vmem:[#allocation8 + $0xd8] sm:$0xff]  ;;  %v3026_v15 = vld [vmem:[#allocation8 + $0x288] sm:$0xff]  ;;  %v475_v38 = vrot.slane %v4389_v47, %v474_v17 }
 0x1da   :  { %v3929_v51 = vpack.c.bf16 %v2972_v44, %v2971_v43  ;;  %v3041_v43 = vld [vmem:[#allocation8 + $0x300] sm:$0xff]  ;;  %v3047_v17 = vld [vmem:[#allocation8 + $0x330] sm:$0xff] }
 0x1dc   :  { %2812 = vmatpush1.bf16.msra.mxu0 %v3764_v48  ;;  %2935 = vmatpush1.bf16.msra.mxu1 %v3766_v49  ;;  %v478_v48 = vsub.s32 1, %v4387_v34  ;;  %v3959_v49 = vpack.c.bf16 %v2986_v42, %v2985_v40  ;;  %v3973_v40 = vpack.c.bf16 %v3026_v15, %v3025_v31  ;;  %v3010_v42 = vld [vmem:[#allocation8 + $0x208] sm:$0xff] }
 0x1dd   :  { %3910 = vmatprep.subr.bf16.mxu0 %v3909_v50  ;;  %3942 = vmatprep.subr.bf16.mxu1 %v3941_v55  ;;  %v486_v50 = vsub.s32 3, %v4387_v34  ;;  %v2987_v55 = vld [vmem:[#allocation8 + $0x150] sm:$0xff]  ;;  %v3050_v15 = vld [vmem:[#allocation8 + $0x348] sm:$0xff] }
 0x1de   :  { %v3963_v2 = vpack.c.bf16 %v2988_v58, %v2987_v55  ;;  %v3012_v58 = vld [vmem:[#allocation8 + $0x218] sm:$0xff] }
 0x1df   :  { %2814 = vmatmul.mubr.bf16.vlgmr.msra.gmra.mrb[4].mxu0 %v4371_v36  ;;  %2937 = vmatmul.mubr.bf16.vlgmr.msra.gmra.mrb[4].mxu1 %v4371_v36  ;;  %v3951_v36 = vpack.c.bf16 %v2982_v14, %v2981_v11  ;;  %v487_v1 = vrot.slane %v4389_v47, %v486_v50  ;;  %v3008_v11 = vld [vmem:[#allocation8 + $0x1f8] sm:$0xff] }
 0x1e0   :  { %3912 = vmatpush3.bf16.msra.mxu0 %v3911_v62  ;;  %3944 = vmatpush3.bf16.msra.mxu1 %v3943_v63  ;;  %v3006_v62 = vld [vmem:[#allocation8 + $0x1e8] sm:$0xff]  ;;  %v479_v63 = vrot.slane %v4389_v47, %v478_v48  ;;  %v3969_v29 = vpack.c.bf16 %v3008_v11, %v3007_v22  ;;  %v3028_v48 = vld [vmem:[#allocation8 + $0x298] sm:$0xff] }
 0x1e1   :  { %3914 = vmatprep.subr.bf16.mxu0 %v3913_v0  ;;  %3946 = vmatprep.subr.bf16.mxu1 %v3945_v57  ;;  %v3931_v0 = vpack.c.bf16 %v2956_v54, %v2955_v52  ;;  %v2957_v57 = vld [vmem:[#allocation8 + $0x60] sm:$0xff]  ;;  %v3965_v6 = vpack.c.bf16 %v3006_v62, %v3005_v61  ;;  %v3060_v50 = vld [vmem:[#allocation8 + $0x398] sm:$0xff]  ;;  %v4007_v54 = vpack.c.bf16 %v3042_v46, %v3041_v43 }
 0x1e2   :  { %v3935_v32 = vpack.c.bf16 %v2958_v3, %v2957_v57  ;;  %v3044_v62 = vld [vmem:[#allocation8 + $0x318] sm:$0xff] }
 0x1e3   :  { %v4011_v57 = vpack.c.bf16 %v3044_v62, %v3043_v59  ;;  %v3064_v22 = vld [vmem:[#allocation8 + $0x3b8] sm:$0xff]  ;;  %v3053_v59 = vld [vmem:[#allocation8 + $0x360] sm:$0xff] }
 0x1e4   :  { %3916 = vmatpush3.bf16.msra.mxu0 %v3915_v7  ;;  %3948 = vmatpush3.bf16.msra.mxu1 %v3947_v8  ;;  %v2975_v7 = vld [vmem:[#allocation8 + $0xf0] sm:$0xff]  ;;  %v2976_v8 = vld [vmem:[#allocation8 + $0xf8] sm:$0xff] }
 0x1e5   :  { %3918 = vmatprep.subr.bf16.mxu0 %v3917_v9  ;;  %3950 = vmatprep.subr.bf16.mxu1 %v3949_v13  ;;  %v3020_v43 = vld [vmem:[#allocation8 + $0x258] sm:$0xff] }
 0x1e6   :  { %v3052_v46 = vld [vmem:[#allocation8 + $0x358] sm:$0xff] }
 0x1e8   :  { %3920 = vmatpush3.bf16.msra.mxu0 %v3919_v19  ;;  %3952 = vmatpush3.bf16.msra.mxu1 %v3951_v36  ;;  %v3967_v36 = vpack.c.bf16 %v2990_v53, %v2989_v4  ;;  %v3013_v4 = vld [vmem:[#allocation8 + $0x220] sm:$0xff] }
 0x1e9   :  { %3922 = vmatprep.subr.bf16.mxu0 %v3921_v21  ;;  %3954 = vmatprep.subr.bf16.mxu1 %v3953_v27  ;;  %v3937_v21 = vpack.c.bf16 %v2976_v8, %v2975_v7  ;;  %v482_v27 = vsub.s32 2, %v4387_v34  ;;  %v3046_v7 = vld [vmem:[#allocation8 + $0x328] sm:$0xff]  ;;  %v3031_v8 = vld [vmem:[#allocation8 + $0x2b0] sm:$0xff] }
 0x1eb   :  { %v483_v44 = vrot.slane %v4389_v47, %v482_v27 }
 0x1ec   :  { %3924 = vmatpush3.bf16.msra.mxu0 %v3923_v33  ;;  %3956 = vmatpush3.bf16.msra.mxu1 %v3955_v35  ;;  %v3057_v33 = vld [vmem:[#allocation8 + $0x380] sm:$0xff]  ;;  %v3058_v35 = vld [vmem:[#allocation8 + $0x388] sm:$0xff] }
 0x1ed   :  { %3926 = vmatprep.subr.bf16.mxu0 %v3925_v37  ;;  %3958 = vmatprep.subr.bf16.mxu1 %v3957_v41  ;;  %v3939_v37 = vpack.c.bf16 %v2960_v24, %v2959_v23  ;;  %v3009_v41 = vld [vmem:[#allocation8 + $0x200] sm:$0xff]  ;;  %v4005_v45 = vpack.c.bf16 %v3058_v35, %v3057_v33  ;;  %v3066_v23 = vld [vmem:[#allocation8 + $0x3c8] sm:$0xff]  ;;  %v3035_v33 = vld [vmem:[#allocation8 + $0x2d0] sm:$0xff] }
 0x1ee   :  { %v3036_v35 = vld [vmem:[#allocation8 + $0x2d8] sm:$0xff] }
 0x1f0   :  { %3928 = vmatpush3.bf16.msra.mxu0 %v3927_v25  ;;  %3960 = vmatpush3.bf16.msra.mxu1 %v3959_v49  ;;  %v3027_v25 = vld [vmem:[#allocation8 + $0x290] sm:$0xff] }
 0x1f1   :  { %3930 = vmatprep.subr.bf16.mxu0 %v3929_v51  ;;  %3962 = vmatprep.subr.bf16.mxu1 %v3961_v56  ;;  %v3059_v49 = vld [vmem:[#allocation8 + $0x390] sm:$0xff]  ;;  %v3975_v51 = vpack.c.bf16 %v3010_v42, %v3009_v41  ;;  %v3977_v55 = vpack.c.bf16 %v3028_v48, %v3027_v25  ;;  %v3993_v41 = vpack.c.bf16 %v3036_v35, %v3035_v33  ;;  %v3037_v25 = vld [vmem:[#allocation8 + $0x2e0] sm:$0xff]  ;;  %v3038_v48 = vld [vmem:[#allocation8 + $0x2e8] sm:$0xff] }
 0x1f2   :  { %v2569_v5 = vpop.f32.mrb[0].mxu0  ;;  %v2692_v9 = vpop.f32.mrb[0].mxu1  ;;  %v3011_v56 = vld [vmem:[#allocation8 + $0x210] sm:$0xff]  ;;  %v4009_v61 = vpack.c.bf16 %v3060_v50, %v3059_v49  ;;  %v3069_v49 = vld [vmem:[#allocation8 + $0x3e0] sm:$0xff]  ;;  %v3070_v50 = vld [vmem:[#allocation8 + $0x3e8] sm:$0xff] }
 0x1f3   :  { %v2571_v10 = vpop.f32.mrb[1].mxu0  ;;  %v2694_v14 = vpop.f32.mrb[1].mxu1  ;;  %v4037_v52 = vadd.f32 %v2569_v5, %v475_v38  ;;  %v4039_v60 = vadd.f32 %v2692_v9, %v483_v44  ;;  %v3014_v5 = vld [vmem:[#allocation8 + $0x228] sm:$0xff]  ;;  %v3032_v9 = vld [vmem:[#allocation8 + $0x2b8] sm:$0xff]  ;;  %v3019_v42 = vld [vmem:[#allocation8 + $0x250] sm:$0xff] }
 0x1f4   :  { %v4038_v13 = vadd.f32 %v2571_v10, %v479_v63  ;;  %v2573_v16 = vpop.f32.mrb[2].mxu0  ;;  %3932 = vmatpush3.bf16.msra.mxu0 %v3931_v0  ;;  %v4040_v18 = vadd.f32 %v2694_v14, %v487_v1  ;;  %v2696_v19 = vpop.f32.mrb[2].mxu1  ;;  %3964 = vmatpush3.bf16.msra.mxu1 %v3963_v2  ;;  %v3029_v63 = vld [vmem:[#allocation8 + $0x2a0] sm:$0xff]  ;;  %v3030_v0 = vld [vmem:[#allocation8 + $0x2a8] sm:$0xff]  ;;  %v3063_v10 = vld [vmem:[#allocation8 + $0x3b0] sm:$0xff]  ;;  %v3983_v11 = vpack.c.bf16 %v3014_v5, %v3013_v4 }
 0x1f5   :  { %v2574_v20 = vpop.f32.mrb[3].mxu0  ;;  %3934 = vmatprep.subr.bf16.mxu0 %v3933_v12  ;;  %v2697_v28 = vpop.f32.mrb[3].mxu1  ;;  %3966 = vmatprep.subr.bf16.mxu1 %v3965_v6  ;;  %v3061_v1 = vld [vmem:[#allocation8 + $0x3a0] sm:$0xff]  ;;  %v3062_v2 = vld [vmem:[#allocation8 + $0x3a8] sm:$0xff]  ;;  %v3979_v12 = vpack.c.bf16 %v3012_v58, %v3011_v56  ;;  %v3981_v3 = vpack.c.bf16 %v3030_v0, %v3029_v63  ;;  %v3985_v14 = vpack.c.bf16 %v3032_v9, %v3031_v8  ;;  %v3015_v16 = vld [vmem:[#allocation8 + $0x230] sm:$0xff]  ;;  %v494_v8 = vsub.s32 5, %v4387_v34 }
 0x1f6   :  { %3144 = vmatprep.mubr.f32.mxu0 %v4038_v13  ;;  %3214 = vmatprep.mubr.f32.mxu1 %v4040_v18  ;;  %v3045_v6 = vld [vmem:[#allocation8 + $0x320] sm:$0xff]  ;;  %v4013_v53 = vpack.c.bf16 %v3062_v2, %v3061_v1  ;;  %v4017_v18 = vpack.c.bf16 %v3064_v22, %v3063_v10  ;;  %v3048_v19 = vld [vmem:[#allocation8 + $0x338] sm:$0xff]  ;;  %v3051_v44 = vld [vmem:[#allocation8 + $0x350] sm:$0xff]  ;;  %v4029_v58 = vpack.c.bf16 %v3070_v50, %v3069_v49  ;;  %v490_v9 = vsub.s32 4, %v4387_v34 }
 0x1f7   :  { %v4015_v13 = vpack.c.bf16 %v3046_v7, %v3045_v6  ;;  %v3033_v20 = vld [vmem:[#allocation8 + $0x2c0] sm:$0xff]  ;;  %v4019_v26 = vpack.c.bf16 %v3048_v19, %v3047_v17  ;;  %v3068_v38 = vld [vmem:[#allocation8 + $0x3d8] sm:$0xff]  ;;  %v3022_v56 = vld [vmem:[#allocation8 + $0x268] sm:$0xff]  ;;  %v502_v10 = vsub.s32 7, %v4387_v34  ;;  %v498_v22 = vsub.s32 6, %v4387_v34 }
 0x1f8   :  { %3936 = vmatpush3.bf16.msra.mxu0 %v3935_v32  ;;  %3968 = vmatpush3.bf16.msra.mxu1 %v3967_v36  ;;  %v3016_v32 = vld [vmem:[#allocation8 + $0x238] sm:$0xff]  ;;  %v3034_v36 = vld [vmem:[#allocation8 + $0x2c8] sm:$0xff]  ;;  %v3017_v28 = vld [vmem:[#allocation8 + $0x240] sm:$0xff] }
 0x1f9   :  { %3938 = vmatprep.subr.bf16.mxu0 %v3937_v21  ;;  %3970 = vmatprep.subr.bf16.mxu1 %v3969_v29  ;;  %v3065_v21 = vld [vmem:[#allocation8 + $0x3c0] sm:$0xff]  ;;  %v3987_v24 = vpack.c.bf16 %v3016_v32, %v3015_v16  ;;  %v3989_v27 = vpack.c.bf16 %v3034_v36, %v3033_v20  ;;  %v3018_v29 = vld [vmem:[#allocation8 + $0x248] sm:$0xff]  ;;  %v3039_v63 = vld [vmem:[#allocation8 + $0x2f0] sm:$0xff]  ;;  %v499_v32 = vrot.slane %v4389_v47, %v498_v22 }
 0x1fa   :  { %v4021_v31 = vpack.c.bf16 %v3066_v23, %v3065_v21  ;;  %v3040_v0 = vld [vmem:[#allocation8 + $0x2f8] sm:$0xff]  ;;  %v3071_v1 = vld [vmem:[#allocation8 + $0x3f0] sm:$0xff] }
 0x1fb   :  { %v4001_v2 = vpack.c.bf16 %v3040_v0, %v3039_v63  ;;  %v3055_v6 = vld [vmem:[#allocation8 + $0x370] sm:$0xff] }
 0x1fc   :  { %3940 = vmatpush3.bf16.msra.mxu0 %v3939_v37  ;;  %3972 = vmatpush3.bf16.msra.mxu1 %v3971_v39  ;;  %v3067_v37 = vld [vmem:[#allocation8 + $0x3d0] sm:$0xff]  ;;  %v3991_v39 = vpack.c.bf16 %v3018_v29, %v3017_v28 }
 0x1fd   :  { %3974 = vmatprep.subr.bf16.mxu0 %v3973_v40  ;;  %4006 = vmatprep.subr.bf16.mxu1 %v4005_v45  ;;  %v4023_v40 = vpack.c.bf16 %v3050_v15, %v3049_v30  ;;  %v4025_v45 = vpack.c.bf16 %v3068_v38, %v3067_v37  ;;  %v3768_v30 = vld [vmem:[#allocation10] ss:$0 sm:$0xff] }
 0x1ff   :  { %3145 = vmatmul.mubr.f32.vlgmr.msra.gmra.mrb[8].mxu0 %v4037_v52  ;;  %3215 = vmatmul.mubr.f32.vlgmr.msra.gmra.mrb[8].mxu1 %v4039_v60  ;;  %v4027_v52 = vpack.c.bf16 %v3052_v46, %v3051_v44  ;;  %v3054_v60 = vld [vmem:[#allocation8 + $0x368] sm:$0xff] }
 0x200   :  { %3976 = vmatpush3.bf16.msra.mxu0 %v3975_v51  ;;  %4008 = vmatpush3.bf16.msra.mxu1 %v4007_v54  ;;  %v3995_v51 = vpack.c.bf16 %v3020_v43, %v3019_v42  ;;  %v3997_v54 = vpack.c.bf16 %v3038_v48, %v3037_v25  ;;  %v4031_v62 = vpack.c.bf16 %v3054_v60, %v3053_v59 }
 0x201   :  { %3978 = vmatprep.subr.bf16.mxu0 %v3977_v55  ;;  %4010 = vmatprep.subr.bf16.mxu1 %v4009_v61  ;;  %v3021_v55 = vld [vmem:[#allocation8 + $0x260] sm:$0xff] }
 0x202   :  { %v3999_v61 = vpack.c.bf16 %v3022_v56, %v3021_v55 }
 0x204   :  { %3980 = vmatpush3.bf16.msra.mxu0 %v3979_v12  ;;  %4012 = vmatpush3.bf16.msra.mxu1 %v4011_v57  ;;  %v3072_v12 = vld [vmem:[#allocation8 + $0x3f8] sm:$0xff]  ;;  %v3023_v57 = vld [vmem:[#allocation8 + $0x270] sm:$0xff] }
 0x205   :  { %3982 = vmatprep.subr.bf16.mxu0 %v3981_v3  ;;  %4014 = vmatprep.subr.bf16.mxu1 %v4013_v53  ;;  %v3024_v3 = vld [vmem:[#allocation8 + $0x278] sm:$0xff]  ;;  %v4033_v4 = vpack.c.bf16 %v3072_v12, %v3071_v1 }
 0x206   :  { %v4003_v5 = vpack.c.bf16 %v3024_v3, %v3023_v57  ;;  %v3056_v53 = vld [vmem:[#allocation8 + $0x378] sm:$0xff] }
 0x207   :  { %v4035_v7 = vpack.c.bf16 %v3056_v53, %v3055_v6 }
 0x208   :  { %3984 = vmatpush3.bf16.msra.mxu0 %v3983_v11  ;;  %4016 = vmatpush3.bf16.msra.mxu1 %v4015_v13  ;;  %v495_v11 = vrot.slane %v4389_v47, %v494_v8  ;;  %v491_v13 = vrot.slane %v4389_v47, %v490_v9 }
 0x209   :  { %3986 = vmatprep.subr.bf16.mxu0 %v3985_v14  ;;  %4018 = vmatprep.subr.bf16.mxu1 %v4017_v18  ;;  %v503_v14 = vrot.slane %v4389_v47, %v502_v10 }
 0x20c   :  { %3988 = vmatpush3.bf16.msra.mxu0 %v3987_v24  ;;  %4020 = vmatpush3.bf16.msra.mxu1 %v4019_v26 }
 0x20d   :  { %3990 = vmatprep.subr.bf16.mxu0 %v3989_v27  ;;  %4022 = vmatprep.subr.bf16.mxu1 %v4021_v31 }
 0x210   :  { %3992 = vmatpush3.bf16.msra.mxu0 %v3991_v39  ;;  %4024 = vmatpush3.bf16.msra.mxu1 %v4023_v40 }
 0x211   :  { %3994 = vmatprep.subr.bf16.mxu0 %v3993_v41  ;;  %4026 = vmatprep.subr.bf16.mxu1 %v4025_v45 }
 0x214   :  { %3996 = vmatpush3.bf16.msra.mxu0 %v3995_v51  ;;  %4028 = vmatpush3.bf16.msra.mxu1 %v4027_v52 }
 0x215   :  { %3998 = vmatprep.subr.bf16.mxu0 %v3997_v54  ;;  %4030 = vmatprep.subr.bf16.mxu1 %v4029_v58 }
 0x218   :  { %4000 = vmatpush3.bf16.msra.mxu0 %v3999_v61  ;;  %4032 = vmatpush3.bf16.msra.mxu1 %v4031_v62 }
 0x219   :  { %4002 = vmatprep.subr.bf16.mxu0 %v4001_v2  ;;  %4034 = vmatprep.subr.bf16.mxu1 %v4033_v4 }
 0x21c   :  { %4004 = vmatpush3.bf16.msra.mxu0 %v4003_v5  ;;  %4036 = vmatpush3.bf16.msra.mxu1 %v4035_v7 }
 0x2b2   :  { %v2815_v16 = vpop.f32.mrb[4].mxu0  ;;  %v2938_v17 = vpop.f32.mrb[4].mxu1 }
 0x2b3   :  { %v2817_v18 = vpop.f32.mrb[5].mxu0  ;;  %v2940_v20 = vpop.f32.mrb[5].mxu1  ;;  %v4041_v21 = vadd.f32 %v2815_v16, %v491_v13  ;;  %v4043_v27 = vadd.f32 %v2938_v17, %v499_v32 }
 0x2b4   :  { %v4042_v19 = vadd.f32 %v2817_v18, %v495_v11  ;;  %v2819_v36 = vpop.f32.mrb[6].mxu0  ;;  %v4044_v23 = vadd.f32 %v2940_v20, %v503_v14  ;;  %v2942_v24 = vpop.f32.mrb[6].mxu1 }
 0x2b5   :  { %v2820_v26 = vpop.f32.mrb[7].mxu0  ;;  %v2943_v34 = vpop.f32.mrb[7].mxu1 }
 0x2b6   :  { %3284 = vmatprep.mubr.f32.mxu0 %v4042_v19  ;;  %3354 = vmatprep.mubr.f32.mxu1 %v4044_v23 }
 0x2b7   :  { %3285 = vmatmul.mubr.f32.vlgmr.msra.gmra.mrb[10].mxu0 %v4041_v21  ;;  %3355 = vmatmul.mubr.f32.vlgmr.msra.gmra.mrb[10].mxu1 %v4043_v27 }
 0x2d2   :  { %v3801_v28 = vpop.f32.mrb[8].mxu0  ;;  %v3836_v29 = vpop.f32.mrb[8].mxu1 }
 0x2d3   :  { %v3802_v31 = vpop.f32.mrb[9].mxu0  ;;  %v3837_v15 = vpop.f32.mrb[9].mxu1 }
 0x2d4   :  { %v3803_v47 = vadd.f32 %v3802_v31, %v3801_v28  ;;  %v3838_v33 = vadd.f32 %v3837_v15, %v3836_v29 }
 0x2d6   :  { %v3147_v35 = vadd.f32 %v3803_v47, %v3768_v30 }
 0x2d8   :  { %v3217_v37 = vadd.f32 %v3838_v33, %v3147_v35 }
 0x38a   :  { %v3871_v38 = vpop.f32.mrb[10].mxu0  ;;  %v3906_v39 = vpop.f32.mrb[10].mxu1 }
 0x38b   :  { %v3872_v40 = vpop.f32.mrb[11].mxu0  ;;  %v3907_v42 = vpop.f32.mrb[11].mxu1 }
 0x38c   :  { %v3873_v41 = vadd.f32 %v3872_v40, %v3871_v38  ;;  %v3908_v43 = vadd.f32 %v3907_v42, %v3906_v39 }
 0x38e   :  { %v3287_v44 = vadd.f32 %v3873_v41, %v3217_v37 }
 0x390   :  { %v3357_v45 = vadd.f32 %v3908_v43, %v3287_v44 }
 0x392   :  { %3360 = vst [vmem:[#allocation11] sm:$0xff] %v3357_v45 }
 0x393   :  { %4214 = shalt.err (!%p4211_p2)
}
 0x394   :  { %s4215_s6 = scalar_lea.hbm %s4424_s5, 128 }
 0x395   :  { %p4216_p3 = scmp.ne.s32.totalorder %s4424_s5, %s4215_s6  ;;  %p4219_p4 = scmp.lt.u32.totalorder %s4215_s6, %s4424_s5 }
 0x397   :  { %p4221_p5 = pnand %p4219_p4, %p4216_p3 }
 0x399   :  { %4224 = shalt.err (!%p4221_p5)
}
 0x39a   :  { %3370 = dma.vmem_to_hbm [thread:$0]  %s3368_s28, 128, %s4424_s5, [#allocation4]  }
 0x39b   :  { %4231 = dma.done.wait [#allocation4], 128  }
 0x39c   :  { %4232 = vsyncadd [#allocation4], 4294967168 }
 0x39d   :  { %3374 = vsyncpa [#allocation3], 1 }
 0x39e   :  { %3375 = vsyncpa [#allocation6], 1 }
 0x39f   :  { %3376 = vsyncpa [#allocation9], 1 }
 0x3a0   :  { %3377 = vsyncpa [#allocation4], 1 }

</bundles_post_ra>
